<compile_context>
chip_gen: v7x
topology: tpu7x:2x2x1
jax: 0.10.0
libtpu: 0.0.40
codegen_flags: <defaults>
</compile_context>

<pallas_src>
import functools

import jax
import jax.numpy as jnp
from jax.experimental import pallas as pl
from jax.experimental.pallas import tpu as pltpu


def _sepconv_kernel(cur_ref, nxt_ref, wdw_ref, wpw_ref, o_ref, win_ref, *,
                    TH, W, K, p, mxu_dtype):
    # cur_ref: (1, TH, Wp, C)       main rows of the zero-padded NHWC input tile
    # nxt_ref: (1, >=2p, Wp, C)     halo rows just below the main rows
    # wdw_ref: (K, K, C)            depthwise weights (resident across the grid)
    # wpw_ref: (C, Cout)            pointwise weights (resident across the grid)
    # o_ref  : (1, Cout, TH*W)      lane-dense output tile
    # win_ref: (TH+2p, Wp, C)       VMEM scratch: assembled window for this tile
    win_ref[0:TH] = cur_ref[0]
    win_ref[TH:TH + 2 * p] = nxt_ref[0][0:2 * p]

    xt = win_ref[...].astype(jnp.float32)            # hoisted cast, (TH+2p, Wp, C)
    wd = wdw_ref[...].astype(jnp.float32)            # hoisted cast, (K, K, C)
    C = xt.shape[-1]

    # Depthwise 3x3 (VPU): di walks the major (un-tiled) H axis -> free slices;
    # the dj width shift is hoisted so only K-1 sublane relayouts happen per tile.
    acc = jnp.zeros((TH, W, C), dtype=jnp.float32)
    for dj in range(K):
        xs = xt[:, dj:dj + W, :]                     # (TH+2p, W, C)
        for di in range(K):
            acc = acc + xs[di:di + TH] * wd[di, dj]  # per-channel weight on the lane axis

    # Pointwise 1x1 (MXU): M = TH*W (>=128), K = C, N = Cout.
    lhs = acc.reshape(TH * W, C).astype(mxu_dtype)   # free re-tiling when W % 8 == 0
    rhs = wpw_ref[...].astype(mxu_dtype)
    res = jnp.dot(lhs, rhs, preferred_element_type=jnp.float32)   # (TH*W, Cout)

    # Transpose the small result tile so the HBM store is lane-dense (last dim TH*W).
    o_ref[0] = res.T.astype(o_ref.dtype)


def _pick_block_h(H, W, Wp, C, Cout, itemsize, p):
    """Output rows per grid step: divides H, keeps the output tile lane-dense
    (TH*W % 128 == 0), keeps the thin-halo indexing valid (TH % 2p == 0) and keeps
    the per-step blocks a few MiB.  Falls back to the whole image if nothing fits."""
    budget = 4 * 1024 * 1024
    cand = []
    for d in range(1, H + 1):
        if H % d:
            continue
        if d < H and (d * W) % 128 != 0:
            continue
        if d < H and d % (2 * p) != 0:
            continue
        blk_bytes = (d * Wp * C + Cout * d * W) * itemsize * 2
        if d < H and blk_bytes > budget:
            continue
        cand.append(d)
    tiled = [d for d in cand if d < H]
    return max(tiled) if tiled else H


def separable_conv2d(x_nchw, w_dw, w_pw, *, padding=1, block_h=None):
    """x_nchw: (N, C, H, W); w_dw: (C, 1, K, K); w_pw: (Cout, C, 1, 1)."""
    N, C, H, W = x_nchw.shape
    K = w_dw.shape[-1]
    Cout = w_pw.shape[0]
    p = padding
    Hp, Wp = H + 2 * p, W + 2 * p

    # Layout glue: NCHW -> NHWC + zero-pad in one fused XLA pass.  Output needs no
    # transpose at all (kernel writes NC(HW) directly).
    x_win = jnp.pad(jnp.transpose(x_nchw, (0, 2, 3, 1)),
                    ((0, 0), (p, p), (p, p), (0, 0)))          # (N, Hp, Wp, C)
    wdw = jnp.transpose(w_dw[:, 0, :, :], (1, 2, 0))           # (K, K, C)
    wpw = jnp.transpose(w_pw[:, :, 0, 0], (1, 0))              # (C, Cout)

    itemsize = jnp.dtype(x_nchw.dtype).itemsize
    TH = block_h if block_h is not None else _pick_block_h(H, W, Wp, C, Cout, itemsize, p)
    assert H % TH == 0, (H, TH)
    num_i = H // TH
    THp = TH + 2 * p

    # bf16 inputs feed the MXU in bf16 (v6e/v7x); accumulation stays f32 (v5e-safe).
    mxu_dtype = jnp.bfloat16 if x_nchw.dtype == jnp.bfloat16 else jnp.float32

    # Main-row spec and a thin 2p-row halo spec on the same padded array.  When TH is not
    # a multiple of 2p, fall back to reading the full next tile (only its first 2p rows
    # are used; the boundary block is partial but its first 2p rows are always valid).
    cur_spec = pl.BlockSpec((1, TH, Wp, C), lambda n, i: (n, i, 0, 0))
    if TH % (2 * p) == 0:
        halo_rows = 2 * p
        halo_spec = pl.BlockSpec((1, halo_rows, Wp, C),
                                 lambda n, i: (n, (i + 1) * (TH // (2 * p)), 0, 0))
    else:
        halo_rows = TH
        halo_spec = pl.BlockSpec((1, TH, Wp, C), lambda n, i: (n, i + 1, 0, 0))

    # Explicit scoped-VMEM limit: double-buffered in/out blocks + scratch window + weights,
    # with headroom, capped at 64 MiB so the plan is valid on v7x as well.
    need = (2 * TH * Wp * C * itemsize
            + 2 * halo_rows * Wp * C * itemsize
            + 2 * Cout * TH * W * itemsize
            + THp * Wp * C * itemsize
            + (K * K * C + C * Cout) * itemsize)
    vmem_limit = int(min(max(4 * need, 32 * 1024 * 1024), 64 * 1024 * 1024))

    kernel = functools.partial(_sepconv_kernel, TH=TH, W=W, K=K, p=p,
                               mxu_dtype=mxu_dtype)

    out_flat = pl.pallas_call(
        kernel,
        out_shape=jax.ShapeDtypeStruct((N, Cout, H * W), x_nchw.dtype),
        grid_spec=pltpu.PrefetchScalarGridSpec(
            num_scalar_prefetch=0,
            grid=(N, num_i),
            in_specs=[
                cur_spec,
                halo_spec,
                pl.BlockSpec((K, K, C), lambda n, i: (0, 0, 0)),   # resident weights
                pl.BlockSpec((C, Cout), lambda n, i: (0, 0)),      # resident weights
            ],
            out_specs=pl.BlockSpec((1, Cout, TH * W), lambda n, i: (n, 0, i)),
            scratch_shapes=[pltpu.VMEM((THp, Wp, C), x_win.dtype)],
        ),
        compiler_params=pltpu.CompilerParams(
            dimension_semantics=("parallel", "parallel"),
            vmem_limit_bytes=vmem_limit),
    )(x_win, x_win, wdw, wpw)

    # Metadata-only reshape back to the PyTorch NCHW convention.
    return out_flat.reshape(N, Cout, H, W)


def _reference(x_nchw, w_dw, w_pw, *, padding=1):
    """Pure-JAX reference (lax conv) for validation."""
    C = x_nchw.shape[1]
    dw = jax.lax.conv_general_dilated(
        x_nchw, w_dw, window_strides=(1, 1),
        padding=[(padding, padding), (padding, padding)],
        feature_group_count=C,
        dimension_numbers=("NCHW", "OIHW", "NCHW"))
    pw = jax.lax.conv_general_dilated(
        dw, w_pw, window_strides=(1, 1), padding=[(0, 0), (0, 0)],
        dimension_numbers=("NCHW", "OIHW", "NCHW"))
    return pw


if __name__ == "__main__":
    N, Cin, Cout, H, W, K = 2, 4, 8, 16, 16, 3

    key = jax.random.PRNGKey(0)
    kx, kd, kp = jax.random.split(key, 3)
    x = jax.random.normal(kx, (N, Cin, H, W), dtype=jnp.float32)
    # Deterministic synthetic weights (shapes match nn.Conv2d with groups / 1x1).
    w_dw = jax.random.normal(kd, (Cin, 1, K, K), dtype=jnp.float32) * 0.1
    w_pw = jax.random.normal(kp, (Cout, Cin, 1, 1), dtype=jnp.float32) * 0.1

    out = jax.block_until_ready(separable_conv2d(x, w_dw, w_pw, padding=1))
    ref = jax.block_until_ready(_reference(x, w_dw, w_pw, padding=1))

    assert out.shape == (N, Cout, H, W), out.shape
    assert jnp.allclose(out, ref, rtol=1e-4, atol=1e-4), float(jnp.abs(out - ref).max())

    print("KERNEL_OK")
</pallas_src>

<mosaic_0001>
module attributes {stable_mosaic.version = 11 : i64} {
  func.func @_sepconv_kernel(%arg0: i32, %arg1: i32, %arg2: memref<1x8x18x4xf32, #tpu.memory_space<vmem>>, %arg3: memref<1x2x18x4xf32, #tpu.memory_space<vmem>>, %arg4: memref<3x3x4xf32, #tpu.memory_space<vmem>>, %arg5: memref<4x8xf32, #tpu.memory_space<vmem>>, %arg6: memref<1x8x128xf32, #tpu.memory_space<vmem>>, %arg7: memref<10x18x4xf32, #tpu.memory_space<vmem>>) attributes {dimension_semantics = [#tpu.dimension_semantics<parallel>, #tpu.dimension_semantics<parallel>], iteration_bounds = array<i64: 2, 2>, scalar_prefetch = 0 : i64, scratch_operands = 1 : i64, tpu.core_type = #tpu.core_type<tc>, window_params = [{transform_indices = @transform_0, window_bounds = array<i64: 1, 8, 18, 4>}, {transform_indices = @transform_1, window_bounds = array<i64: 1, 2, 18, 4>}, {pipeline_mode = #tpu.pipeline_mode<synchronous>, transform_indices = @transform_2, window_bounds = array<i64: 3, 3, 4>}, {pipeline_mode = #tpu.pipeline_mode<synchronous>, transform_indices = @transform_3, window_bounds = array<i64: 4, 8>}, {transform_indices = @transform_4, window_bounds = array<i64: 1, 8, 128>}]} {
    %c0 = arith.constant 0 : index
    %c0_0 = arith.constant 0 : index
    %c0_1 = arith.constant 0 : index
    %c0_2 = arith.constant 0 : index
    %0 = vector.load %arg2[%c0, %c0_0, %c0_1, %c0_2] : memref<1x8x18x4xf32, #tpu.memory_space<vmem>>, vector<1x8x18x4xf32>
    %1 = vector.shape_cast %0 : vector<1x8x18x4xf32> to vector<8x18x4xf32>
    %c0_3 = arith.constant 0 : index
    %c0_4 = arith.constant 0 : index
    %c0_5 = arith.constant 0 : index
    %2 = vector.load %arg7[%c0_3, %c0_4, %c0_5] : memref<10x18x4xf32, #tpu.memory_space<vmem>>, vector<8x18x4xf32>
    tpu.vector_store %arg7[%c0_3, %c0_4, %c0_5], %1 {strides = array<i32>} : memref<10x18x4xf32, #tpu.memory_space<vmem>>, vector<8x18x4xf32>,
    %c0_6 = arith.constant 0 : index
    %c0_7 = arith.constant 0 : index
    %c0_8 = arith.constant 0 : index
    %c0_9 = arith.constant 0 : index
    %3 = vector.load %arg3[%c0_6, %c0_7, %c0_8, %c0_9] : memref<1x2x18x4xf32, #tpu.memory_space<vmem>>, vector<1x2x18x4xf32>
    %4 = vector.shape_cast %3 : vector<1x2x18x4xf32> to vector<2x18x4xf32>
    %c8 = arith.constant 8 : index
    %c0_10 = arith.constant 0 : index
    %c0_11 = arith.constant 0 : index
    %5 = vector.load %arg7[%c8, %c0_10, %c0_11] : memref<10x18x4xf32, #tpu.memory_space<vmem>>, vector<2x18x4xf32>
    tpu.vector_store %arg7[%c8, %c0_10, %c0_11], %4 {strides = array<i32>} : memref<10x18x4xf32, #tpu.memory_space<vmem>>, vector<2x18x4xf32>,
    %c0_12 = arith.constant 0 : index
    %c0_13 = arith.constant 0 : index
    %c0_14 = arith.constant 0 : index
    %6 = vector.load %arg7[%c0_12, %c0_13, %c0_14] : memref<10x18x4xf32, #tpu.memory_space<vmem>>, vector<10x18x4xf32>
    %c0_15 = arith.constant 0 : index
    %c0_16 = arith.constant 0 : index
    %c0_17 = arith.constant 0 : index
    %7 = vector.load %arg4[%c0_15, %c0_16, %c0_17] : memref<3x3x4xf32, #tpu.memory_space<vmem>>, vector<3x3x4xf32>
    %cst = arith.constant 0.000000e+00 : f32
    %8 = vector.broadcast %cst : f32 to vector<8x16x4xf32>
    %9 = vector.extract_strided_slice %6 {offsets = [0, 0, 0], sizes = [10, 16, 4], strides = [1, 1, 1]} : vector<10x18x4xf32> to vector<10x16x4xf32>
    %10 = vector.extract_strided_slice %9 {offsets = [0, 0, 0], sizes = [8, 16, 4], strides = [1, 1, 1]} : vector<10x16x4xf32> to vector<8x16x4xf32>
    %11 = vector.extract_strided_slice %7 {offsets = [0, 0, 0], sizes = [1, 1, 4], strides = [1, 1, 1]} : vector<3x3x4xf32> to vector<1x1x4xf32>
    %12 = vector.shape_cast %11 : vector<1x1x4xf32> to vector<4xf32>
    %13 = vector.shape_cast %12 : vector<4xf32> to vector<1x1x4xf32>
    %14 = vector.broadcast %13 : vector<1x1x4xf32> to vector<8x16x4xf32>
    %15 = arith.mulf %10, %14 : vector<8x16x4xf32>
    %16 = arith.addf %8, %15 : vector<8x16x4xf32>
    %17 = vector.extract_strided_slice %9 {offsets = [1, 0, 0], sizes = [8, 16, 4], strides = [1, 1, 1]} : vector<10x16x4xf32> to vector<8x16x4xf32>
    %18 = vector.extract_strided_slice %7 {offsets = [1, 0, 0], sizes = [1, 1, 4], strides = [1, 1, 1]} : vector<3x3x4xf32> to vector<1x1x4xf32>
    %19 = vector.shape_cast %18 : vector<1x1x4xf32> to vector<4xf32>
    %20 = vector.shape_cast %19 : vector<4xf32> to vector<1x1x4xf32>
    %21 = vector.broadcast %20 : vector<1x1x4xf32> to vector<8x16x4xf32>
    %22 = arith.mulf %17, %21 : vector<8x16x4xf32>
    %23 = arith.addf %16, %22 : vector<8x16x4xf32>
    %24 = vector.extract_strided_slice %9 {offsets = [2, 0, 0], sizes = [8, 16, 4], strides = [1, 1, 1]} : vector<10x16x4xf32> to vector<8x16x4xf32>
    %25 = vector.extract_strided_slice %7 {offsets = [2, 0, 0], sizes = [1, 1, 4], strides = [1, 1, 1]} : vector<3x3x4xf32> to vector<1x1x4xf32>
    %26 = vector.shape_cast %25 : vector<1x1x4xf32> to vector<4xf32>
    %27 = vector.shape_cast %26 : vector<4xf32> to vector<1x1x4xf32>
    %28 = vector.broadcast %27 : vector<1x1x4xf32> to vector<8x16x4xf32>
    %29 = arith.mulf %24, %28 : vector<8x16x4xf32>
    %30 = arith.addf %23, %29 : vector<8x16x4xf32>
    %31 = vector.extract_strided_slice %6 {offsets = [0, 1, 0], sizes = [10, 16, 4], strides = [1, 1, 1]} : vector<10x18x4xf32> to vector<10x16x4xf32>
    %32 = vector.extract_strided_slice %31 {offsets = [0, 0, 0], sizes = [8, 16, 4], strides = [1, 1, 1]} : vector<10x16x4xf32> to vector<8x16x4xf32>
    %33 = vector.extract_strided_slice %7 {offsets = [0, 1, 0], sizes = [1, 1, 4], strides = [1, 1, 1]} : vector<3x3x4xf32> to vector<1x1x4xf32>
    %34 = vector.shape_cast %33 : vector<1x1x4xf32> to vector<4xf32>
    %35 = vector.shape_cast %34 : vector<4xf32> to vector<1x1x4xf32>
    %36 = vector.broadcast %35 : vector<1x1x4xf32> to vector<8x16x4xf32>
    %37 = arith.mulf %32, %36 : vector<8x16x4xf32>
    %38 = arith.addf %30, %37 : vector<8x16x4xf32>
    %39 = vector.extract_strided_slice %31 {offsets = [1, 0, 0], sizes = [8, 16, 4], strides = [1, 1, 1]} : vector<10x16x4xf32> to vector<8x16x4xf32>
    %40 = vector.extract_strided_slice %7 {offsets = [1, 1, 0], sizes = [1, 1, 4], strides = [1, 1, 1]} : vector<3x3x4xf32> to vector<1x1x4xf32>
    %41 = vector.shape_cast %40 : vector<1x1x4xf32> to vector<4xf32>
    %42 = vector.shape_cast %41 : vector<4xf32> to vector<1x1x4xf32>
    %43 = vector.broadcast %42 : vector<1x1x4xf32> to vector<8x16x4xf32>
    %44 = arith.mulf %39, %43 : vector<8x16x4xf32>
    %45 = arith.addf %38, %44 : vector<8x16x4xf32>
    %46 = vector.extract_strided_slice %31 {offsets = [2, 0, 0], sizes = [8, 16, 4], strides = [1, 1, 1]} : vector<10x16x4xf32> to vector<8x16x4xf32>
    %47 = vector.extract_strided_slice %7 {offsets = [2, 1, 0], sizes = [1, 1, 4], strides = [1, 1, 1]} : vector<3x3x4xf32> to vector<1x1x4xf32>
    %48 = vector.shape_cast %47 : vector<1x1x4xf32> to vector<4xf32>
    %49 = vector.shape_cast %48 : vector<4xf32> to vector<1x1x4xf32>
    %50 = vector.broadcast %49 : vector<1x1x4xf32> to vector<8x16x4xf32>
    %51 = arith.mulf %46, %50 : vector<8x16x4xf32>
    %52 = arith.addf %45, %51 : vector<8x16x4xf32>
    %53 = vector.extract_strided_slice %6 {offsets = [0, 2, 0], sizes = [10, 16, 4], strides = [1, 1, 1]} : vector<10x18x4xf32> to vector<10x16x4xf32>
    %54 = vector.extract_strided_slice %53 {offsets = [0, 0, 0], sizes = [8, 16, 4], strides = [1, 1, 1]} : vector<10x16x4xf32> to vector<8x16x4xf32>
    %55 = vector.extract_strided_slice %7 {offsets = [0, 2, 0], sizes = [1, 1, 4], strides = [1, 1, 1]} : vector<3x3x4xf32> to vector<1x1x4xf32>
    %56 = vector.shape_cast %55 : vector<1x1x4xf32> to vector<4xf32>
    %57 = vector.shape_cast %56 : vector<4xf32> to vector<1x1x4xf32>
    %58 = vector.broadcast %57 : vector<1x1x4xf32> to vector<8x16x4xf32>
    %59 = arith.mulf %54, %58 : vector<8x16x4xf32>
    %60 = arith.addf %52, %59 : vector<8x16x4xf32>
    %61 = vector.extract_strided_slice %53 {offsets = [1, 0, 0], sizes = [8, 16, 4], strides = [1, 1, 1]} : vector<10x16x4xf32> to vector<8x16x4xf32>
    %62 = vector.extract_strided_slice %7 {offsets = [1, 2, 0], sizes = [1, 1, 4], strides = [1, 1, 1]} : vector<3x3x4xf32> to vector<1x1x4xf32>
    %63 = vector.shape_cast %62 : vector<1x1x4xf32> to vector<4xf32>
    %64 = vector.shape_cast %63 : vector<4xf32> to vector<1x1x4xf32>
    %65 = vector.broadcast %64 : vector<1x1x4xf32> to vector<8x16x4xf32>
    %66 = arith.mulf %61, %65 : vector<8x16x4xf32>
    %67 = arith.addf %60, %66 : vector<8x16x4xf32>
    %68 = vector.extract_strided_slice %53 {offsets = [2, 0, 0], sizes = [8, 16, 4], strides = [1, 1, 1]} : vector<10x16x4xf32> to vector<8x16x4xf32>
    %69 = vector.extract_strided_slice %7 {offsets = [2, 2, 0], sizes = [1, 1, 4], strides = [1, 1, 1]} : vector<3x3x4xf32> to vector<1x1x4xf32>
    %70 = vector.shape_cast %69 : vector<1x1x4xf32> to vector<4xf32>
    %71 = vector.shape_cast %70 : vector<4xf32> to vector<1x1x4xf32>
    %72 = vector.broadcast %71 : vector<1x1x4xf32> to vector<8x16x4xf32>
    %73 = arith.mulf %68, %72 : vector<8x16x4xf32>
    %74 = arith.addf %67, %73 : vector<8x16x4xf32>
    %75 = vector.shape_cast %74 : vector<8x16x4xf32> to vector<128x4xf32>
    %c0_18 = arith.constant 0 : index
    %c0_19 = arith.constant 0 : index
    %76 = vector.load %arg5[%c0_18, %c0_19] : memref<4x8xf32, #tpu.memory_space<vmem>>, vector<4x8xf32>
    %cst_20 = arith.constant dense<0.000000e+00> : vector<128x8xf32>
    %77 = tpu.matmul %75, %76, %cst_20 {dimension_numbers = #tpu.dot_dimension_numbers<[1], [0], [0], [1], [0, 0, 1, 1], [], []>} : vector<128x4xf32>, vector<4x8xf32>, vector<128x8xf32> -> vector<128x8xf32>
    %78 = tpu.transpose %77, [1, 0] : vector<128x8xf32> -> vector<8x128xf32>
    %c0_21 = arith.constant 0 : index
    %c0_22 = arith.constant 0 : index
    %c0_23 = arith.constant 0 : index
    %79 = vector.load %arg6[%c0_21, %c0_22, %c0_23] : memref<1x8x128xf32, #tpu.memory_space<vmem>>, vector<1x8x128xf32>
    %80 = vector.shape_cast %79 : vector<1x8x128xf32> to vector<8x128xf32>
    %81 = vector.shape_cast %78 : vector<8x128xf32> to vector<1x8x128xf32>
    tpu.vector_store %arg6[%c0_21, %c0_22, %c0_23], %81 {strides = array<i32>} : memref<1x8x128xf32, #tpu.memory_space<vmem>>, vector<1x8x128xf32>,
    return
  }
  func.func @transform_0(%arg0: i32, %arg1: i32) -> (i32, i32, i32, i32) {
    %c0_i32 = arith.constant 0 : i32
    %c0_i32_0 = arith.constant 0 : i32
    %c0_i32_1 = arith.constant 0 : i32
    return %arg0, %arg1, %c0_i32, %c0_i32_0 : i32, i32, i32, i32
  }
  func.func @transform_1(%arg0: i32, %arg1: i32) -> (i32, i32, i32, i32) {
    %c1_i32 = arith.constant 1 : i32
    %0 = arith.addi %arg1, %c1_i32 : i32
    %c4_i32 = arith.constant 4 : i32
    %1 = arith.muli %0, %c4_i32 : i32
    %c0_i32 = arith.constant 0 : i32
    %c0_i32_0 = arith.constant 0 : i32
    %c0_i32_1 = arith.constant 0 : i32
    return %arg0, %1, %c0_i32, %c0_i32_0 : i32, i32, i32, i32
  }
  func.func @transform_2(%arg0: i32, %arg1: i32) -> (i32, i32, i32) {
    %c0_i32 = arith.constant 0 : i32
    %c0_i32_0 = arith.constant 0 : i32
    %c0_i32_1 = arith.constant 0 : i32
    %c0_i32_2 = arith.constant 0 : i32
    return %c0_i32, %c0_i32_0, %c0_i32_1 : i32, i32, i32
  }
  func.func @transform_3(%arg0: i32, %arg1: i32) -> (i32, i32) {
    %c0_i32 = arith.constant 0 : i32
    %c0_i32_0 = arith.constant 0 : i32
    %c0_i32_1 = arith.constant 0 : i32
    return %c0_i32, %c0_i32_0 : i32, i32
  }
  func.func @transform_4(%arg0: i32, %arg1: i32) -> (i32, i32, i32) {
    %c0_i32 = arith.constant 0 : i32
    %c0_i32_0 = arith.constant 0 : i32
    return %arg0, %c0_i32, %arg1 : i32, i32, i32
  }
}

</mosaic_0001>

<bundles_post_ra>
// kernel: tpu_custom_call.1
= control target key start
LH: loop header
LB: loop body
LE: loop exit
PB: predicated region body
PF: predicated region fallthrough
CT: control target
= control target key end

     0   :  { %9 = vsyncpa [#allocation4], 0  ;;  %s2676_s0 = inlined_call_operand.vmem [shape: f32[2,18,18,4], index: 0, kind: input, shape index: {}]   ;;  %s2677_s1 = inlined_call_operand.vmem [shape: f32[2,18,18,4], index: 1, kind: input, shape index: {}]   ;;  %s2678_s2 = inlined_call_operand.vmem [shape: f32[3,3,4], index: 2, kind: input, shape index: {}]   ;;  %s2679_s3 = inlined_call_operand.vmem [shape: f32[4,8], index: 3, kind: input, shape index: {}]   ;;  %s2680_s4 = inlined_call_operand.hbm [shape: f32[2,8,256], index: 4, kind: output, shape index: {}]  }
   0x1   :  { %11 = vsyncpa [#allocation4 + $0x1], 0  ;;  %s1891_s15 = smov 0   ;;  %s1893_s16 = smov 0  }
   0x2   :  { %s1895_s17 = smov 0   ;;  %s1897_s18 = smov 0  }
   0x3   :  { %s1899_s19 = smov 0   ;;  %s1901_s20 = smov 0  }
   0x4   :  { %s1903_s21 = smov 0   ;;  %s1905_s22 = smov 0  }
   0x5 LB: > { %s1606_s23 = sadd.s32 4294967295, %s1863_s22   ;;  %s1607_s24 = sadd.s32 4294967294, %s1863_s22   ;;  %s1863_s22 = sphi %s1905_s22, %s17_s22   ;;  %s1859_s21 = sphi %s1903_s21, %s2689_s21   ;;  %s1855_s20 = sphi %s1901_s20, %s2688_s20   ;;  %s1851_s19 = sphi %s1899_s19, %s2687_s19   ;;  %s1847_s18 = sphi %s1897_s18, %s2686_s18   ;;  %s1843_s17 = sphi %s1895_s17, %s2685_s17   ;;  %s1839_s16 = sphi %s1893_s16, %s2684_s16   ;;  %s1835_s15 = sphi %s1891_s15, %s2683_s15  }
   0x6   : > { %s26_s25 = sadd.s32 1, %s1855_s20  ;;  %s29_s26 = sadd.s32 1, %s1859_s21 }
   0x7   : > { %p27_p0 = scmp.ge.s32.totalorder %s26_s25, 2  ;;  %p150_p1 = scmp.ne.s32.totalorder %s1843_s17, %s1839_s16 }
   0x8   : > { %p151_p2 = scmp.eq.s32.totalorder %s1606_s23, 3  ;;  %p156_p5 = scmp.ne.s32.totalorder %s1839_s16, %s1835_s15 }
   0x9   : > { %s2691_s25 = smov (%p27_p0, %s26_s25), 0  ;;  %s2693_s26 = smov (!%p27_p0, %s29_s26), %s1859_s21 }
   0xa   : > { %s136_s27 = ssub.s32 %s1855_s20, %s2691_s25  ;;  %p1942_p3 = por %p151_p2, %p150_p1 }
   0xb   : > { %p31_p4 = scmp.ge.s32.totalorder %s2693_s26, 2  ;;  %p157_p6 = scmp.eq.s32.totalorder %s1607_s24, 3 }
   0xc   : > { %p1612_p7 = scmp.ge.s32.totalorder %s1863_s22, 1  ;;  %p223_p9 = scmp.lt.s32.totalorder %s1863_s22, 5 }
   0xd   : > { %s2695_s26 = smov (%p31_p4, %s2693_s26), 0  ;;  %p1951_p8 = por %p157_p6, %p156_p5 }
   0xe   : > { %s135_s30 = ssub.s32 %s1859_s21, %s2695_s26  ;;  %s140_s5 = sadd.s32 1, %s1843_s17 }
   0xf   : > { %s137_s6 = sor.u32 %s136_s27, %s135_s30  ;;  %p224_p10 = pnand %p1612_p7, %p223_p9 }
  0x10   : > { %p138_p11 = scmp.eq.s32.totalorder %s137_s6, 0  ;;  %v1257_v0 = vld [vmem:[%s2679_s3] sm:$0xf] (!%p224_p10)  ;;  %vm1306_vm0 = vcmask (!%p224_p10), 1043456   ;;  %s1614_s10 = sshll.u32 (!%p224_p10), %s1847_s18, 3  ;;  %v403_v1 = vlaneseq (!%p224_p10)  ;;  %vm331_vm1 = vcmask (!%p224_p10), 31744  }
  0x11   : > { %227 = sbr.rel (%p224_p10) target bundleno = 493 (0x1ed), region = 36  ;;  %p277_p12 = scmp.lt.s32.totalorder (!%p224_p10), %s1851_s19, 1  ;;  %1667 = vmatprep.subr.msk.mxu0 (!%p224_p10), %vm1306_vm0, %v1257_v0  ;;  %1693 = vmatprep.subr.msk.mxu1 (!%p224_p10), %vm1306_vm0, %v1257_v0  ;;  %v400_v6 = vld [vmem:[%s2678_s2] sm:$0x7] (!%p224_p10)  ;;  %v1987_v7 = vld [vmem:[%s2678_s2 + $0x4] sm:$0x7] (!%p224_p10) }
  0x12   : > { %s1960_s7 = scalar_select %p138_p11, %s1843_s17, %s140_s5  }
  0x13   : > { %p279_p13 = scmp.lt.s32.totalorder (!%p224_p10), %s1614_s10, 17  ;;  %1668 = vmatpush3.msk.msra.mxu0 (!%p224_p10), %vm1306_vm0, %v1257_v0  ;;  %1694 = vmatpush3.msk.msra.mxu1 (!%p224_p10), %vm1306_vm0, %v1257_v0  ;;  %s1649_s14 = sadd.s32 (!%p224_p10), 8, %s1614_s10  ;;  %v404_v2 = vshrl.u32 (!%p224_p10), %v403_v1, 7  ;;  %vm334_vm2 = vcmask (!%p224_p10), 25600   ;;  %v402_v11 = vld [vmem:[%s2678_s2 + $0x8] sm:$0x7] (!%p224_p10) }
  0x14   : > { %p297_p0 = scmp.lt.s32.totalorder (!%p224_p10), %s1649_s14, 17  ;;  %vm563_vm3 = vcmask (!%p224_p10), 1046528   ;;  %vm936_vm4 = vcmask (!%p224_p10), 1045504   ;;  %s1637_s9 = sshll.u32 (!%p224_p10), %s1851_s19, 1 }
  0x15   : > { %v405_v12 = vsub.s32 (!%p224_p10), 0, %v404_v2  ;;  %v513_v13 = vsub.s32 (!%p224_p10), 1, %v404_v2  ;;  %v886_v20 = vsub.s32 (!%p224_p10), 2, %v404_v2 }
  0x17   : > { %v2019_v24 = vrot.slane (!%p224_p10), %v400_v6, %v405_v12  ;;  %v2022_v25 = vrot.slane (!%p224_p10), %v1987_v7, %v405_v12  ;;  %v2024_v26 = vrot.slane (!%p224_p10), %v400_v6, %v513_v13  ;;  %v2032_v30 = vrot.slane (!%p224_p10), %v402_v11, %v405_v12 }
  0x18   : > { %s1968_s11 = scalar_select %p277_p12, %s1851_s19, 1  ;;  %v2035_v31 = vrot.slane %v1987_v7, %v513_v13  ;;  %v2043_v35 = vrot.slane %v402_v11, %v513_v13  ;;  %v2059_v42 = vrot.slane %v400_v6, %v886_v20  ;;  %v2062_v43 = vrot.slane %v1987_v7, %v886_v20 }
  0x19   : > { %s280_s12 = scalar_select %p279_p13, %s1614_s10, 17  ;;  %v2064_v44 = vrot.slane %v402_v11, %v886_v20 }
  0x1a   : > { %s1696_s13 = smul.u32 54, %s1968_s11  ;;  %s2697_s14 = smov (!%p297_p0, %s1649_s14), 17 }
  0x1b   : > { %s1695_s23 = smul.u32 3, %s280_s12  ;;  %s1500_s10 = sadd.s32 %s1847_s18, %s1637_s9 }
  0x1c   : > { %s1865_s18 = smov [#allocation3]  }
  0x1d   : > { %s283_s24 = sadd.s32 %s1696_s13, %s1695_s23  ;;  %s1773_s19 = sshll.u32 %s1865_s18, 4  ;;  %s1774_s19 = int_to_ptr.vmem [resolvable:$false] %s1773_s19 }
  0x1e   : > { %s1615_s27 = sshll.u32 %s283_s24, 3  ;;  %s1638_s24 = sshll.u32 %s1500_s10, 7 }
  0x1f   : > { %s1976_s6 = scalar_lea.vmem %s2676_s0, %s1615_s27  ;;  %s1697_s27 = smul.u32 3, %s2697_s14 }
  0x20   : > { %v307_v3 = vld [vmem:[%s1976_s6] sm:$0xff]  ;;  %v308_v4 = vld [vmem:[%s1976_s6 + $0x8] sm:$0xff]  ;;  %v310_v5 = vld [vmem:[%s1976_s6 + $0x18] sm:$0xff] }
  0x21   : > { %v311_v8 = vld [vmem:[%s1976_s6 + $0x20] sm:$0xff]  ;;  %v313_v9 = vld [vmem:[%s1976_s6 + $0x30] sm:$0xff]  ;;  %v314_v10 = vld [vmem:[%s1976_s6 + $0x38] sm:$0xff]  ;;  %332 = vst.msk [vmem:[#allocation2] sm:$0xff] %vm331_vm1, %v307_v3  ;;  %s2055_s30 = sadd.s32 %s1697_s27, %s1696_s13 }
  0x22   : > { %333 = vst.msk [vmem:[#allocation2 + $0x8] sm:$0xff] %vm331_vm1, %v308_v4  ;;  %336 = vst.msk [vmem:[#allocation2 + $0x18] sm:$0xff] %vm331_vm1, %v310_v5  ;;  %v309_v14 = vld [vmem:[%s1976_s6 + $0x10] sm:$0x3]  ;;  %v312_v15 = vld [vmem:[%s1976_s6 + $0x28] sm:$0x3] }
  0x23   : > { %337 = vst.msk [vmem:[#allocation2 + $0x20] sm:$0xff] %vm331_vm1, %v311_v8  ;;  %339 = vst.msk [vmem:[#allocation2 + $0x30] sm:$0xff] %vm331_vm1, %v313_v9  ;;  %v315_v16 = vld [vmem:[%s1976_s6 + $0x40] sm:$0x3]  ;;  %v316_v17 = vld [vmem:[%s1976_s6 + $0x48] sm:$0xff]  ;;  %s1618_s11 = sshll.u32 %s2055_s30, 3 }
  0x24   : > { %340 = vst.msk [vmem:[#allocation2 + $0x38] sm:$0xff] %vm331_vm1, %v314_v10  ;;  %v317_v18 = vld [vmem:[%s1976_s6 + $0x50] sm:$0xff]  ;;  %v318_v19 = vld [vmem:[%s1976_s6 + $0x58] sm:$0x3]  ;;  %342 = vst.msk [vmem:[#allocation2 + $0x48] sm:$0xff] %vm331_vm1, %v316_v17  ;;  %s303_s5 = scalar_lea.vmem %s2677_s1, %s1618_s11  ;;  %s2625_s11 = scalar_lea.hbm %s2680_s4, %s1638_s24 }
  0x25   : > { %335 = vst.msk [vmem:[#allocation2 + $0x10] sm:$0x3] %vm334_vm2, %v309_v14  ;;  %338 = vst.msk [vmem:[#allocation2 + $0x28] sm:$0x3] %vm334_vm2, %v312_v15  ;;  %v319_v21 = vld [vmem:[%s1976_s6 + $0x60] sm:$0xff]  ;;  %v320_v22 = vld [vmem:[%s1976_s6 + $0x68] sm:$0xff] }
  0x26   : > { %341 = vst.msk [vmem:[#allocation2 + $0x40] sm:$0x3] %vm334_vm2, %v315_v16  ;;  %344 = vst.msk [vmem:[#allocation2 + $0x58] sm:$0x3] %vm334_vm2, %v318_v19  ;;  %v321_v23 = vld [vmem:[%s1976_s6 + $0x70] sm:$0x3] }
  0x27   : > { %343 = vst.msk [vmem:[#allocation2 + $0x50] sm:$0xff] %vm331_vm1, %v317_v18  ;;  %345 = vst.msk [vmem:[#allocation2 + $0x60] sm:$0xff] %vm331_vm1, %v319_v21  ;;  %v322_v27 = vld [vmem:[%s1976_s6 + $0x78] sm:$0xff]  ;;  %v323_v28 = vld [vmem:[%s1976_s6 + $0x80] sm:$0xff] }
  0x28   : > { %346 = vst.msk [vmem:[#allocation2 + $0x68] sm:$0xff] %vm331_vm1, %v320_v22  ;;  %v324_v29 = vld [vmem:[%s1976_s6 + $0x88] sm:$0x3]  ;;  %348 = vst.msk [vmem:[#allocation2 + $0x78] sm:$0xff] %vm331_vm1, %v322_v27  ;;  %v325_v32 = vld [vmem:[%s1976_s6 + $0x90] sm:$0xff] }
  0x29   : > { %347 = vst.msk [vmem:[#allocation2 + $0x70] sm:$0x3] %vm334_vm2, %v321_v23  ;;  %350 = vst.msk [vmem:[#allocation2 + $0x88] sm:$0x3] %vm334_vm2, %v324_v29  ;;  %v326_v33 = vld [vmem:[%s1976_s6 + $0x98] sm:$0xff]  ;;  %v328_v36 = vld [vmem:[%s1976_s6 + $0xa8] sm:$0xff] }
  0x2a   : > { %349 = vst.msk [vmem:[#allocation2 + $0x80] sm:$0xff] %vm331_vm1, %v323_v28  ;;  %v327_v34 = vld [vmem:[%s1976_s6 + $0xa0] sm:$0x3]  ;;  %351 = vst.msk [vmem:[#allocation2 + $0x90] sm:$0xff] %vm331_vm1, %v325_v32  ;;  %v329_v37 = vld [vmem:[%s1976_s6 + $0xb0] sm:$0xff] }
  0x2b   : > { %352 = vst.msk [vmem:[#allocation2 + $0x98] sm:$0xff] %vm331_vm1, %v326_v33  ;;  %v330_v38 = vld [vmem:[%s1976_s6 + $0xb8] sm:$0x3]  ;;  %v370_v39 = vld [vmem:[#allocation2] sm:$0xff]  ;;  %v371_v40 = vld [vmem:[#allocation2 + $0x8] sm:$0xff]  ;;  %s268_s6 = sand.u32 1, %s1839_s16  }
  0x2c   : > { %353 = vst.msk [vmem:[#allocation2 + $0xa0] sm:$0x3] %vm334_vm2, %v327_v34  ;;  %v2057_v41 = vld [vmem:[#allocation2 + $0x18] sm:$0xff]  ;;  %356 = vst.msk [vmem:[#allocation2 + $0xb8] sm:$0x3] %vm334_vm2, %v330_v38  ;;  %v2069_v45 = vld [vmem:[#allocation2 + $0x20] sm:$0xff]  ;;  %v407_v47 = vmul.f32 %v2019_v24, %v370_v39  ;;  %v408_v48 = vmul.f32 %v2019_v24, %v371_v40  ;;  %v515_v50 = vmul.f32 %v2024_v26, %v370_v39 }
  0x2d   : > { %354 = vst.msk [vmem:[#allocation2 + $0xa8] sm:$0xff] %vm331_vm1, %v328_v36  ;;  %355 = vst.msk [vmem:[#allocation2 + $0xb0] sm:$0xff] %vm331_vm1, %v329_v37  ;;  %v2071_v46 = vld [vmem:[#allocation2 + $0x30] sm:$0xff]  ;;  %v443_v49 = vmul.f32 %v2022_v25, %v2057_v41  ;;  %v444_v51 = vmul.f32 %v2022_v25, %v2069_v45  ;;  %v2083_v53 = vmul.f32 %v2024_v26, %v371_v40  ;;  %v2088_v55 = vld [vmem:[#allocation2 + $0x38] sm:$0xff]  ;;  %s1613_s8 = sshll.u32 %s268_s6, 3  ;;  %s1489_s13 = scalar_lea.sflag [#allocation4], %s268_s6 }
  0x2e   : > { %v479_v52 = vmul.f32 %v2032_v30, %v2071_v46  ;;  %v640_v54 = vmul.f32 %v2035_v31, %v2057_v41  ;;  %v564_v57 = vrot.slane %v515_v50, 1  ;;  %v641_v58 = vmul.f32 %v2035_v31, %v2069_v45  ;;  %v372_v8 = vld [vmem:[#allocation2 + $0x10] sm:$0x3]  ;;  %v2111_v13 = vld [vmem:[#allocation2 + $0x28] sm:$0x3]  ;;  %v357_v19 = vld [vmem:[%s303_s5] sm:$0xff] }
  0x2f   : > { %v459_v56 = vadd.f32 %v443_v49, %v407_v47  ;;  %v764_v59 = vmul.f32 %v2043_v35, %v2071_v46  ;;  %v460_v60 = vadd.f32 %v444_v51, %v408_v48  ;;  %v565_v61 = vrot.slane %v2083_v53, 1  ;;  %v2113_v14 = vld [vmem:[#allocation2 + $0x40] sm:$0x3]  ;;  %v358_v20 = vld [vmem:[%s303_s5 + $0x8] sm:$0xff]  ;;  %v359_v21 = vld [vmem:[%s303_s5 + $0x10] sm:$0x3] }
  0x30   : > { %v688_v62 = vrot.slane %v640_v54, 1  ;;  %v2097_v63 = vmul.f32 %v2043_v35, %v2088_v55  ;;  %v689_v1 = vrot.slane %v641_v58, 1  ;;  %v888_v3 = vmul.f32 %v2059_v42, %v370_v39  ;;  %364 = vst.msk [vmem:[#allocation2 + $0xc0] sm:$0xff] %vm331_vm1, %v357_v19  ;;  %365 = vst.msk [vmem:[#allocation2 + $0xc8] sm:$0xff] %vm331_vm1, %v358_v20  ;;  %v360_v29 = vld [vmem:[%s303_s5 + $0x18] sm:$0xff]  ;;  %v361_v32 = vld [vmem:[%s303_s5 + $0x20] sm:$0xff] }
  0x31   : > { %v495_v0 = vadd.f32 %v479_v52, %v459_v56  ;;  %v812_v2 = vrot.slane %v764_v59, 1  ;;  %v566_v4 = vsel %vm563_vm3, %v564_v57, %v565_v61  ;;  %v889_v6 = vmul.f32 %v2059_v42, %v371_v40  ;;  %366 = vst.msk [vmem:[#allocation2 + $0xd0] sm:$0x3] %vm334_vm2, %v359_v21  ;;  %v362_v33 = vld [vmem:[%s303_s5 + $0x28] sm:$0x3]  ;;  %s270_s12 = scalar_lea.vmem [#allocation3], %s1613_s8 }
  0x32   : > { %v813_v5 = vrot.slane %v2097_v63, 1  ;;  %v1013_v7 = vmul.f32 %v2062_v43, %v2057_v41  ;;  %v690_v10 = vsel %vm563_vm3, %v688_v62, %v689_v1  ;;  %v937_v11 = vrot.slane %v888_v3, 2  ;;  %367 = vst.msk [vmem:[#allocation2 + $0xd8] sm:$0xff] %vm331_vm1, %v360_v29  ;;  %368 = vst.msk [vmem:[#allocation2 + $0xe0] sm:$0xff] %vm331_vm1, %v361_v32  ;;  %s1504_s23 = sshll.u32 %s270_s12, 4  ;;  %s1775_s5 = scalar_lea.vmem %s1774_s19, 256  ;;  %s2620_s23 = int_to_ptr.vmem [resolvable:$true] %s1504_s23 }
  0x33   : > { %v620_v9 = vadd.f32 %v566_v4, %v495_v0  ;;  %v1014_v12 = vmul.f32 %v2062_v43, %v2069_v45  ;;  %v938_v16 = vrot.slane %v889_v6, 2  ;;  %v1137_v18 = vmul.f32 %v2064_v44, %v2071_v46  ;;  %369 = vst.msk [vmem:[#allocation2 + $0xe8] sm:$0x3] %vm334_vm2, %v362_v33  ;;  %v2143_v4 = vld [vmem:[#allocation2 + $0x48] sm:$0xff]  ;;  %s1769_s14 = scalar_lea.vmem %s2620_s23, 128  ;;  %p1776_p5 = scmp.lt.s32.totalorder %s2620_s23, %s1774_s19 }
  0x34   : > { %v814_v15 = vsel %vm563_vm3, %v812_v2, %v813_v5  ;;  %v1061_v17 = vrot.slane %v1013_v7, 2  ;;  %v1138_v27 = vmul.f32 %v2064_v44, %v2088_v55  ;;  %v480_v28 = vmul.f32 %v2032_v30, %v2088_v55  ;;  %p1770_p1 = scmp.ne.s32.totalorder %s2620_s23, %s1769_s14  ;;  %p1777_p6 = scmp.lt.s32.totalorder %s1775_s5, %s1769_s14 }
  0x35   : > { %v744_v22 = vadd.f32 %v690_v10, %v620_v9  ;;  %v1062_v23 = vrot.slane %v1014_v12, 2  ;;  %v939_v34 = vsel %vm936_vm4, %v937_v11, %v938_v16  ;;  %v1185_v36 = vrot.slane %v1137_v18, 2  ;;  %v2160_v18 = vld [vmem:[#allocation2 + $0x50] sm:$0xff] }
  0x36   : > { %v517_v37 = vmul.f32 %v2024_v26, %v372_v8  ;;  %v642_v38 = vmul.f32 %v2035_v31, %v2111_v13  ;;  %v1186_v47 = vrot.slane %v1138_v27, 2  ;;  %v496_v48 = vadd.f32 %v480_v28, %v460_v60  ;;  %p1771_p2 = pnand %p1770_p1, %p1942_p3  ;;  %p1778_p7 = por %p1777_p6, %p1776_p5 }
  0x37   : > { %v868_v39 = vadd.f32 %v814_v15, %v744_v22  ;;  %v1063_v40 = vsel %vm936_vm4, %v1061_v17, %v1062_v23  ;;  %v766_v51 = vmul.f32 %v2043_v35, %v2113_v14  ;;  %v890_v52 = vmul.f32 %v2059_v42, %v372_v8 }
  0x38   : > { %v567_v49 = vrot.slane %v517_v37, 1  ;;  %v691_v50 = vrot.slane %v642_v38, 1  ;;  %v1187_v54 = vsel %vm936_vm4, %v1185_v36, %v1186_v47  ;;  %v1015_v56 = vmul.f32 %v2062_v43, %v2111_v13  ;;  %p1772_p4 = pneg %p1771_p2 }
  0x39   : > { %v993_v53 = vadd.f32 %v939_v34, %v868_v39  ;;  %v1139_v57 = vmul.f32 %v2064_v44, %v2113_v14  ;;  %v815_v60 = vrot.slane %v766_v51, 1  ;;  %v940_v62 = vrot.slane %v890_v52, 2 }
  0x3a   : > { %v568_v58 = vsel %vm563_vm3, %v565_v61, %v567_v49  ;;  %v692_v59 = vsel %vm563_vm3, %v689_v1, %v691_v50  ;;  %v1064_v2 = vrot.slane %v1015_v56, 2  ;;  %v409_v8 = vmul.f32 %v2019_v24, %v2057_v41  ;;  %p1779_p9 = pnand %p1778_p7, %p1772_p4 }
  0x3b   : > { %v1117_v63 = vadd.f32 %v1063_v40, %v993_v53  ;;  %v621_v0 = vadd.f32 %v568_v58, %v496_v48  ;;  %v1188_v3 = vrot.slane %v1139_v57, 2  ;;  %v816_v6 = vsel %vm563_vm3, %v813_v5, %v815_v60 }
  0x3c   : > { %v941_v7 = vsel %vm936_vm4, %v938_v16, %v940_v62  ;;  %v445_v61 = vmul.f32 %v2022_v25, %v2071_v46  ;;  %v1065_v10 = vsel %vm936_vm4, %v1062_v23, %v1064_v2  ;;  %v481_v15 = vmul.f32 %v2032_v30, %v2143_v4  ;;  %v2186_v62 = vld [vmem:[#allocation2 + $0x58] sm:$0x3] }
  0x3d   : > { %v1241_v9 = vadd.f32 %v1187_v54, %v1117_v63  ;;  %v745_v1 = vadd.f32 %v692_v59, %v621_v0  ;;  %v1189_v11 = vsel %vm936_vm4, %v1186_v47, %v1188_v3  ;;  %v518_v5 = vmul.f32 %v2024_v26, %v2057_v41 }
  0x3e   : > { %v461_v12 = vadd.f32 %v445_v61, %v409_v8  ;;  %v519_v16 = vmul.f32 %v2024_v26, %v2069_v45  ;;  %v643_v19 = vmul.f32 %v2035_v31, %v2071_v46  ;;  %v644_v20 = vmul.f32 %v2035_v31, %v2088_v55 }
  0x3f   : > { %1669 = vmatprep.mubr.msk.f32.mxu0 %vm331_vm1, %v1241_v9  ;;  %v869_v17 = vadd.f32 %v816_v6, %v745_v1  ;;  %v767_v21 = vmul.f32 %v2043_v35, %v2143_v4  ;;  %v569_v23 = vrot.slane %v518_v5, 1  ;;  %v768_v28 = vmul.f32 %v2043_v35, %v2160_v18 }
  0x40   : > { %v497_v22 = vadd.f32 %v481_v15, %v461_v12  ;;  %v570_v27 = vrot.slane %v519_v16, 1  ;;  %v693_v32 = vrot.slane %v643_v19, 1  ;;  %v694_v33 = vrot.slane %v644_v20, 1 }
  0x41   : > { %v994_v29 = vadd.f32 %v941_v7, %v869_v17  ;;  %v817_v34 = vrot.slane %v767_v21, 1  ;;  %v818_v37 = vrot.slane %v768_v28, 1  ;;  %v891_v38 = vmul.f32 %v2059_v42, %v2057_v41 }
  0x42   : > { %v571_v36 = vsel %vm563_vm3, %v569_v23, %v570_v27  ;;  %v892_v39 = vmul.f32 %v2059_v42, %v2069_v45  ;;  %v695_v48 = vsel %vm563_vm3, %v693_v32, %v694_v33  ;;  %v1016_v49 = vmul.f32 %v2062_v43, %v2071_v46 }
  0x43   : > { %v1118_v40 = vadd.f32 %v1065_v10, %v994_v29  ;;  %v622_v47 = vadd.f32 %v571_v36, %v497_v22  ;;  %v819_v50 = vsel %vm563_vm3, %v817_v34, %v818_v37  ;;  %v942_v51 = vrot.slane %v891_v38, 2 }
  0x44   : > { %v943_v52 = vrot.slane %v892_v39, 2  ;;  %v1017_v53 = vmul.f32 %v2062_v43, %v2088_v55  ;;  %v1066_v41 = vrot.slane %v1016_v49, 2  ;;  %v1140_v57 = vmul.f32 %v2064_v44, %v2143_v4 }
  0x45   : > { %v1242_v54 = vadd.f32 %v1189_v11, %v1118_v40  ;;  %v746_v56 = vadd.f32 %v695_v48, %v622_v47  ;;  %v1141_v60 = vmul.f32 %v2064_v44, %v2160_v18  ;;  %v410_v63 = vmul.f32 %v2019_v24, %v2069_v45 }
  0x46   : > { %v944_v58 = vsel %vm936_vm4, %v942_v51, %v943_v52  ;;  %v1067_v59 = vrot.slane %v1017_v53, 2  ;;  %v1190_v2 = vrot.slane %v1140_v57, 2  ;;  %v446_v3 = vmul.f32 %v2022_v25, %v2088_v55 }
  0x47   : > { %1670 = vmatmul.mubr.msk.f32.vlgmr.msra.gmra.mrb[0].mxu0 %vm331_vm1, %v1242_v54  ;;  %v870_v0 = vadd.f32 %v819_v50, %v746_v56  ;;  %v482_v6 = vmul.f32 %v2032_v30, %v2160_v18  ;;  %v1191_v8 = vrot.slane %v1141_v60, 2  ;;  %v520_v61 = vmul.f32 %v2024_v26, %v2111_v13  ;;  %v2234_v56 = vld [vmem:[#allocation2 + $0x68] sm:$0xff] }
  0x48   : > { %v1068_v7 = vsel %vm936_vm4, %v1066_v41, %v1067_v59  ;;  %v645_v9 = vmul.f32 %v2035_v31, %v2113_v14  ;;  %v462_v1 = vadd.f32 %v446_v3, %v410_v63  ;;  %v769_v10 = vmul.f32 %v2043_v35, %v2186_v62 }
  0x49   : > { %v995_v45 = vadd.f32 %v944_v58, %v870_v0  ;;  %v893_v11 = vmul.f32 %v2059_v42, %v2111_v13  ;;  %v1192_v12 = vsel %vm936_vm4, %v1190_v2, %v1191_v8  ;;  %v572_v15 = vrot.slane %v520_v61, 1  ;;  %v2211_v13 = vld [vmem:[#allocation2 + $0x60] sm:$0xff] }
  0x4a   : > { %v696_v5 = vrot.slane %v645_v9, 1  ;;  %v1018_v16 = vmul.f32 %v2062_v43, %v2113_v14  ;;  %v498_v19 = vadd.f32 %v482_v6, %v462_v1  ;;  %v820_v20 = vrot.slane %v769_v10, 1 }
  0x4b   : > { %v1119_v17 = vadd.f32 %v1068_v7, %v995_v45  ;;  %v945_v21 = vrot.slane %v893_v11, 2  ;;  %v573_v22 = vsel %vm563_vm3, %v570_v27, %v572_v15  ;;  %v1142_v29 = vmul.f32 %v2064_v44, %v2186_v62 }
  0x4c   : > { %v697_v23 = vsel %vm563_vm3, %v694_v33, %v696_v5  ;;  %v1069_v28 = vrot.slane %v1018_v16, 2  ;;  %v623_v34 = vadd.f32 %v573_v22, %v498_v19  ;;  %v821_v36 = vsel %vm563_vm3, %v818_v37, %v820_v20  ;;  %v2256_v22 = vld [vmem:[#allocation2 + $0x70] sm:$0x3] }
  0x4d   : > { %v1243_v32 = vadd.f32 %v1192_v12, %v1119_v17  ;;  %v946_v38 = vsel %vm936_vm4, %v943_v52, %v945_v21  ;;  %v1193_v40 = vrot.slane %v1142_v29, 2  ;;  %v411_v27 = vmul.f32 %v2019_v24, %v2071_v46 }
  0x4e   : > { %v1070_v39 = vsel %vm936_vm4, %v1067_v59, %v1069_v28  ;;  %v447_v33 = vmul.f32 %v2022_v25, %v2143_v4  ;;  %v747_v47 = vadd.f32 %v697_v23, %v623_v34  ;;  %v483_v48 = vmul.f32 %v2032_v30, %v2211_v13 }
  0x4f   : > { %1672 = vmatprep.mubr.msk.f32.mxu0 %vm331_vm1, %v1243_v32  ;;  %v521_v37 = vmul.f32 %v2024_v26, %v2071_v46  ;;  %v2227_v49 = vmul.f32 %v2024_v26, %v2088_v55  ;;  %v1194_v50 = vsel %vm936_vm4, %v1191_v8, %v1193_v40  ;;  %v646_v52 = vmul.f32 %v2035_v31, %v2143_v4 }
  0x50   : > { %v463_v51 = vadd.f32 %v447_v33, %v411_v27  ;;  %v647_v53 = vmul.f32 %v2035_v31, %v2160_v18  ;;  %v871_v54 = vadd.f32 %v821_v36, %v747_v47  ;;  %v770_v58 = vmul.f32 %v2043_v35, %v2211_v13 }
  0x51   : > { %v574_v41 = vrot.slane %v521_v37, 1  ;;  %v575_v57 = vrot.slane %v2227_v49, 1  ;;  %v698_v60 = vrot.slane %v646_v52, 1  ;;  %v771_v0 = vmul.f32 %v2043_v35, %v2234_v56 }
  0x52   : > { %v499_v59 = vadd.f32 %v483_v48, %v463_v51  ;;  %v699_v63 = vrot.slane %v647_v53, 1  ;;  %v996_v2 = vadd.f32 %v946_v38, %v871_v54  ;;  %v822_v6 = vrot.slane %v770_v58, 1 }
  0x53   : > { %v576_v3 = vsel %vm563_vm3, %v574_v41, %v575_v57  ;;  %v894_v7 = vmul.f32 %v2059_v42, %v2071_v46  ;;  %v823_v9 = vrot.slane %v771_v0, 1  ;;  %v895_v45 = vmul.f32 %v2059_v42, %v2088_v55 }
  0x54   : > { %v624_v8 = vadd.f32 %v576_v3, %v499_v59  ;;  %v700_v61 = vsel %vm563_vm3, %v698_v60, %v699_v63  ;;  %v1120_v1 = vadd.f32 %v1070_v39, %v996_v2  ;;  %v1019_v11 = vmul.f32 %v2062_v43, %v2143_v4  ;;  %v2280_v60 = vld [vmem:[#allocation2 + $0x78] sm:$0xff] }
  0x55   : > { %v947_v10 = vrot.slane %v894_v7, 2  ;;  %v1020_v12 = vmul.f32 %v2062_v43, %v2160_v18  ;;  %v824_v5 = vsel %vm563_vm3, %v822_v6, %v823_v9  ;;  %v948_v16 = vrot.slane %v895_v45, 2 }
  0x56   : > { %v748_v15 = vadd.f32 %v700_v61, %v624_v8  ;;  %v1143_v46 = vmul.f32 %v2064_v44, %v2211_v13  ;;  %v1244_v17 = vadd.f32 %v1194_v50, %v1120_v1  ;;  %v1071_v19 = vrot.slane %v1019_v11, 2 }
  0x57   : > { %v1072_v20 = vrot.slane %v1020_v12, 2  ;;  %v1144_v21 = vmul.f32 %v2064_v44, %v2234_v56  ;;  %v949_v28 = vsel %vm936_vm4, %v947_v10, %v948_v16  ;;  %v412_v32 = vmul.f32 %v2019_v24, %v2088_v55 }
  0x58   : > { %v872_v23 = vadd.f32 %v824_v5, %v748_v15  ;;  %v1195_v29 = vrot.slane %v1143_v46, 2  ;;  %1673 = vmatmul.mubr.msk.f32.gmra.mrb[2].mxu0 %vm331_vm1, %v1244_v17  ;;  %v448_v38 = vmul.f32 %v2022_v25, %v2160_v18  ;;  %v484_v39 = vmul.f32 %v2032_v30, %v2234_v56  ;;  %v2301_v15 = vld [vmem:[#allocation2 + $0x80] sm:$0xff] }
  0x59   : > { %v1073_v34 = vsel %vm936_vm4, %v1071_v19, %v1072_v20  ;;  %v1196_v36 = vrot.slane %v1144_v21, 2  ;;  %v523_v27 = vmul.f32 %v2024_v26, %v2113_v14  ;;  %v648_v33 = vmul.f32 %v2035_v31, %v2186_v62 }
  0x5a   : > { %v997_v40 = vadd.f32 %v949_v28, %v872_v23  ;;  %v772_v55 = vmul.f32 %v2043_v35, %v2256_v22  ;;  %v464_v48 = vadd.f32 %v448_v38, %v412_v32  ;;  %v896_v37 = vmul.f32 %v2059_v42, %v2113_v14 }
  0x5b   : > { %v1197_v47 = vsel %vm936_vm4, %v1195_v29, %v1196_v36  ;;  %v1021_v49 = vmul.f32 %v2062_v43, %v2186_v62  ;;  %v577_v51 = vrot.slane %v523_v27, 1  ;;  %v701_v52 = vrot.slane %v648_v33, 1 }
  0x5c   : > { %v1121_v50 = vadd.f32 %v1073_v34, %v997_v40  ;;  %v825_v53 = vrot.slane %v772_v55, 1  ;;  %v500_v54 = vadd.f32 %v484_v39, %v464_v48  ;;  %v950_v41 = vrot.slane %v896_v37, 2 }
  0x5d   : > { %v1074_v58 = vrot.slane %v1021_v49, 2  ;;  %v1145_v59 = vmul.f32 %v2064_v44, %v2256_v22  ;;  %v578_v2 = vsel %vm563_vm3, %v575_v57, %v577_v51  ;;  %v702_v14 = vsel %vm563_vm3, %v699_v63, %v701_v52 }
  0x5e   : > { %v1245_v0 = vadd.f32 %v1197_v47, %v1121_v50  ;;  %v826_v3 = vsel %vm563_vm3, %v823_v9, %v825_v53  ;;  %v625_v6 = vadd.f32 %v578_v2, %v500_v54  ;;  %v951_v7 = vsel %vm936_vm4, %v948_v16, %v950_v41 }
  0x5f   : > { %v1075_v8 = vsel %vm936_vm4, %v1072_v20, %v1074_v58  ;;  %v1198_v61 = vrot.slane %v1145_v59, 2  ;;  %v413_v45 = vmul.f32 %v2019_v24, %v2143_v4  ;;  %v449_v1 = vmul.f32 %v2022_v25, %v2211_v13  ;;  %v2325_v59 = vld [vmem:[#allocation2 + $0x88] sm:$0x3] }
  0x60   : > { %1675 = vmatprep.mubr.msk.f32.mxu0 %vm331_vm1, %v1245_v0  ;;  %v485_v57 = vmul.f32 %v2032_v30, %v2280_v60  ;;  %v524_v63 = vmul.f32 %v2024_v26, %v2143_v4  ;;  %v749_v9 = vadd.f32 %v702_v14, %v625_v6  ;;  %v525_v11 = vmul.f32 %v2024_v26, %v2160_v18 }
  0x61   : > { %v1199_v10 = vsel %vm936_vm4, %v1196_v36, %v1198_v61  ;;  %v649_v12 = vmul.f32 %v2035_v31, %v2211_v13  ;;  %v465_v5 = vadd.f32 %v449_v1, %v413_v45  ;;  %v650_v46 = vmul.f32 %v2035_v31, %v2234_v56 }
  0x62   : > { %v579_v16 = vrot.slane %v524_v63, 1  ;;  %v773_v17 = vmul.f32 %v2043_v35, %v2280_v60  ;;  %v873_v19 = vadd.f32 %v826_v3, %v749_v9  ;;  %v580_v20 = vrot.slane %v525_v11, 1 }
  0x63   : > { %v703_v21 = vrot.slane %v649_v12, 1  ;;  %v774_v23 = vmul.f32 %v2043_v35, %v2301_v15  ;;  %v501_v28 = vadd.f32 %v485_v57, %v465_v5  ;;  %v704_v29 = vrot.slane %v650_v46, 1 }
  0x64   : > { %v827_v32 = vrot.slane %v773_v17, 1  ;;  %v897_v34 = vmul.f32 %v2059_v42, %v2143_v4  ;;  %v998_v36 = vadd.f32 %v951_v7, %v873_v19  ;;  %v581_v38 = vsel %vm563_vm3, %v579_v16, %v580_v20 }
  0x65   : > { %v828_v39 = vrot.slane %v774_v23, 1  ;;  %v898_v40 = vmul.f32 %v2059_v42, %v2160_v18  ;;  %v626_v27 = vadd.f32 %v581_v38, %v501_v28  ;;  %v705_v33 = vsel %vm563_vm3, %v703_v21, %v704_v29 }
  0x66   : > { %v952_v55 = vrot.slane %v897_v34, 2  ;;  %v1022_v47 = vmul.f32 %v2062_v43, %v2211_v13  ;;  %v1122_v48 = vadd.f32 %v1075_v8, %v998_v36  ;;  %v1023_v4 = vmul.f32 %v2062_v43, %v2234_v56 }
  0x67   : > { %v829_v37 = vsel %vm563_vm3, %v827_v32, %v828_v39  ;;  %v953_v49 = vrot.slane %v898_v40, 2  ;;  %v750_v50 = vadd.f32 %v705_v33, %v626_v27  ;;  %v1146_v52 = vmul.f32 %v2064_v44, %v2280_v60  ;;  %v2350_v32 = vld [vmem:[#allocation2 + $0x90] sm:$0xff] }
  0x68   : > { %v1076_v51 = vrot.slane %v1022_v47, 2  ;;  %v1147_v53 = vmul.f32 %v2064_v44, %v2301_v15  ;;  %v1246_v54 = vadd.f32 %v1199_v10, %v1122_v48  ;;  %v1077_v58 = vrot.slane %v1023_v4, 2  ;;  %v2365_v48 = vld [vmem:[#allocation2 + $0x98] sm:$0xff] }
  0x69   : > { %v954_v41 = vsel %vm936_vm4, %v952_v55, %v953_v49  ;;  %v414_v0 = vmul.f32 %v2019_v24, %v2160_v18  ;;  %v874_v2 = vadd.f32 %v829_v37, %v750_v50  ;;  %v1200_v14 = vrot.slane %v1146_v52, 2 }
  0x6a   : > { %v1201_v3 = vrot.slane %v1147_v53, 2  ;;  %v450_v6 = vmul.f32 %v2022_v25, %v2234_v56  ;;  %1676 = vmatmul.mubr.msk.f32.gmra.mrb[4].mxu0 %vm331_vm1, %v1246_v54  ;;  %v1078_v7 = vsel %vm936_vm4, %v1076_v51, %v1077_v58  ;;  %v486_v8 = vmul.f32 %v2032_v30, %v2301_v15 }
  0x6b   : > { %v526_v61 = vmul.f32 %v2024_v26, %v2186_v62  ;;  %v651_v45 = vmul.f32 %v2035_v31, %v2256_v22  ;;  %v999_v18 = vadd.f32 %v954_v41, %v874_v2  ;;  %v775_v63 = vmul.f32 %v2043_v35, %v2325_v59 }
  0x6c   : > { %v1202_v1 = vsel %vm936_vm4, %v1200_v14, %v1201_v3  ;;  %v466_v57 = vadd.f32 %v450_v6, %v414_v0  ;;  %v899_v11 = vmul.f32 %v2059_v42, %v2186_v62  ;;  %v1024_v12 = vmul.f32 %v2062_v43, %v2256_v22 }
  0x6d   : > { %v582_v9 = vrot.slane %v526_v61, 1  ;;  %v706_v10 = vrot.slane %v651_v45, 1  ;;  %v1123_v5 = vadd.f32 %v1078_v7, %v999_v18  ;;  %v830_v46 = vrot.slane %v775_v63, 1 }
  0x6e   : > { %v502_v16 = vadd.f32 %v486_v8, %v466_v57  ;;  %v1148_v17 = vmul.f32 %v2064_v44, %v2325_v59  ;;  %v955_v23 = vrot.slane %v899_v11, 2  ;;  %v1079_v28 = vrot.slane %v1024_v12, 2 }
  0x6f   : > { %v583_v19 = vsel %vm563_vm3, %v580_v20, %v582_v9  ;;  %v707_v21 = vsel %vm563_vm3, %v704_v29, %v706_v10  ;;  %v1247_v34 = vadd.f32 %v1202_v1, %v1123_v5  ;;  %v831_v62 = vsel %vm563_vm3, %v828_v39, %v830_v46 }
  0x70   : > { %v627_v36 = vadd.f32 %v583_v19, %v502_v16  ;;  %v1203_v38 = vrot.slane %v1148_v17, 2  ;;  %v956_v40 = vsel %vm936_vm4, %v953_v49, %v955_v23  ;;  %v1080_v27 = vsel %vm936_vm4, %v1077_v58, %v1079_v28  ;;  %v2392_v17 = vld [vmem:[#allocation2 + $0xa0] sm:$0x3] }
  0x71   : > { %v415_v33 = vmul.f32 %v2019_v24, %v2211_v13  ;;  %v451_v20 = vmul.f32 %v2022_v25, %v2280_v60  ;;  %1678 = vmatprep.mubr.msk.f32.mxu0 %vm331_vm1, %v1247_v34  ;;  %v487_v47 = vmul.f32 %v2032_v30, %v2350_v32  ;;  %v527_v39 = vmul.f32 %v2024_v26, %v2211_v13 }
  0x72   : > { %v751_v29 = vadd.f32 %v707_v21, %v627_v36  ;;  %v1204_v55 = vsel %vm936_vm4, %v1201_v3, %v1203_v38  ;;  %v528_v49 = vmul.f32 %v2024_v26, %v2234_v56  ;;  %v652_v4 = vmul.f32 %v2035_v31, %v2280_v60 }
  0x73   : > { %v467_v37 = vadd.f32 %v451_v20, %v415_v33  ;;  %v653_v50 = vmul.f32 %v2035_v31, %v2301_v15  ;;  %v584_v52 = vrot.slane %v527_v39, 1  ;;  %v776_v53 = vmul.f32 %v2043_v35, %v2350_v32 }
  0x74   : > { %v875_v51 = vadd.f32 %v831_v62, %v751_v29  ;;  %v777_v54 = vmul.f32 %v2043_v35, %v2365_v48  ;;  %v585_v58 = vrot.slane %v528_v49, 1  ;;  %v708_v0 = vrot.slane %v652_v4, 1 }
  0x75   : > { %v503_v41 = vadd.f32 %v487_v47, %v467_v37  ;;  %v709_v2 = vrot.slane %v653_v50, 1  ;;  %v832_v3 = vrot.slane %v776_v53, 1  ;;  %v900_v7 = vmul.f32 %v2059_v42, %v2211_v13 }
  0x76   : > { %v1000_v14 = vadd.f32 %v956_v40, %v875_v51  ;;  %v833_v6 = vrot.slane %v777_v54, 1  ;;  %v586_v8 = vsel %vm563_vm3, %v584_v52, %v585_v58  ;;  %v901_v45 = vmul.f32 %v2059_v42, %v2234_v56 }
  0x77   : > { %v710_v61 = vsel %vm563_vm3, %v708_v0, %v709_v2  ;;  %v1025_v18 = vmul.f32 %v2062_v43, %v2280_v60  ;;  %v628_v57 = vadd.f32 %v586_v8, %v503_v41  ;;  %v957_v9 = vrot.slane %v900_v7, 2  ;;  %v2417_v41 = vld [vmem:[#allocation2 + $0xa8] sm:$0xff] }
  0x78   : > { %v1124_v1 = vadd.f32 %v1080_v27, %v1000_v14  ;;  %v834_v63 = vsel %vm563_vm3, %v832_v3, %v833_v6  ;;  %v958_v10 = vrot.slane %v901_v45, 2  ;;  %v1026_v11 = vmul.f32 %v2062_v43, %v2301_v15 }
  0x79   : > { %v1081_v13 = vrot.slane %v1025_v18, 2  ;;  %v1149_v12 = vmul.f32 %v2064_v44, %v2350_v32  ;;  %v752_v16 = vadd.f32 %v710_v61, %v628_v57  ;;  %v1150_v46 = vmul.f32 %v2064_v44, %v2365_v48 }
  0x7a   : > { %v1248_v5 = vadd.f32 %v1204_v55, %v1124_v1  ;;  %v416_v19 = vmul.f32 %v2019_v24, %v2234_v56  ;;  %v959_v21 = vsel %vm936_vm4, %v957_v9, %v958_v10  ;;  %v1082_v23 = vrot.slane %v1026_v11, 2  ;;  %v2437_v11 = vld [vmem:[#allocation2 + $0xb0] sm:$0xff] }
  0x7b   : > { %v1205_v28 = vrot.slane %v1149_v12, 2  ;;  %v452_v34 = vmul.f32 %v2022_v25, %v2301_v15  ;;  %v876_v36 = vadd.f32 %v834_v63, %v752_v16  ;;  %v1206_v62 = vrot.slane %v1150_v46, 2 }
  0x7c   : > { %1679 = vmatmul.mubr.msk.f32.gmra.mrb[6].mxu0 %vm331_vm1, %v1248_v5  ;;  %v488_v38 = vmul.f32 %v2032_v30, %v2365_v48  ;;  %v529_v40 = vmul.f32 %v2024_v26, %v2256_v22  ;;  %v1083_v27 = vsel %vm936_vm4, %v1081_v13, %v1082_v23  ;;  %v654_v33 = vmul.f32 %v2035_v31, %v2325_v59 }
  0x7d   : > { %v468_v56 = vadd.f32 %v452_v34, %v416_v19  ;;  %v778_v20 = vmul.f32 %v2043_v35, %v2392_v17  ;;  %v1001_v29 = vadd.f32 %v959_v21, %v876_v36  ;;  %v1207_v55 = vsel %vm936_vm4, %v1205_v28, %v1206_v62 }
  0x7e   : > { %v587_v47 = vrot.slane %v529_v40, 1  ;;  %v902_v39 = vmul.f32 %v2059_v42, %v2256_v22  ;;  %v711_v49 = vrot.slane %v654_v33, 1  ;;  %v1027_v50 = vmul.f32 %v2062_v43, %v2325_v59 }
  0x7f   : > { %v504_v37 = vadd.f32 %v488_v38, %v468_v56  ;;  %v835_v4 = vrot.slane %v778_v20, 1  ;;  %v1125_v51 = vadd.f32 %v1083_v27, %v1001_v29  ;;  %v1151_v54 = vmul.f32 %v2064_v44, %v2392_v17 }
  0x80   : > { %v588_v52 = vsel %vm563_vm3, %v585_v58, %v587_v47  ;;  %v960_v53 = vrot.slane %v902_v39, 2  ;;  %v712_v14 = vsel %vm563_vm3, %v709_v2, %v711_v49  ;;  %v1084_v3 = vrot.slane %v1027_v50, 2 }
  0x81   : > { %v629_v0 = vadd.f32 %v588_v52, %v504_v37  ;;  %v836_v22 = vsel %vm563_vm3, %v833_v6, %v835_v4  ;;  %v1249_v7 = vadd.f32 %v1207_v55, %v1125_v51  ;;  %v1208_v61 = vrot.slane %v1151_v54, 2  ;;  %v2461_v54 = vld [vmem:[#allocation2 + $0xb8] sm:$0x3] }
  0x82   : > { %v961_v8 = vsel %vm936_vm4, %v958_v10, %v960_v53  ;;  %v417_v45 = vmul.f32 %v2019_v24, %v2280_v60  ;;  %v1085_v18 = vsel %vm936_vm4, %v1082_v23, %v1084_v3  ;;  %v453_v1 = vmul.f32 %v2022_v25, %v2350_v32 }
  0x83   : > { %v753_v58 = vadd.f32 %v712_v14, %v629_v0  ;;  %v489_v57 = vmul.f32 %v2032_v30, %v2417_v41  ;;  %1681 = vmatprep.mubr.msk.f32.mxu1 %vm331_vm1, %v1249_v7  ;;  %v1209_v2 = vsel %vm936_vm4, %v1206_v62, %v1208_v61  ;;  %v530_v6 = vmul.f32 %v2024_v26, %v2280_v60 }
  0x84   : > { %v531_v63 = vmul.f32 %v2024_v26, %v2301_v15  ;;  %v655_v9 = vmul.f32 %v2035_v31, %v2350_v32  ;;  %v469_v13 = vadd.f32 %v453_v1, %v417_v45  ;;  %v656_v12 = vmul.f32 %v2035_v31, %v2365_v48 }
  0x85   : > { %v877_v10 = vadd.f32 %v836_v22, %v753_v58  ;;  %v779_v5 = vmul.f32 %v2043_v35, %v2417_v41  ;;  %v589_v16 = vrot.slane %v530_v6, 1  ;;  %v780_v21 = vmul.f32 %v2043_v35, %v2437_v11 }
  0x86   : > { %v590_v46 = vrot.slane %v531_v63, 1  ;;  %v713_v19 = vrot.slane %v655_v9, 1  ;;  %v505_v28 = vadd.f32 %v489_v57, %v469_v13  ;;  %v714_v34 = vrot.slane %v656_v12, 1 }
  0x87   : > { %v1002_v23 = vadd.f32 %v961_v8, %v877_v10  ;;  %v837_v36 = vrot.slane %v779_v5, 1  ;;  %v838_v38 = vrot.slane %v780_v21, 1  ;;  %v903_v40 = vmul.f32 %v2059_v42, %v2280_v60 }
  0x88   : > { %v591_v62 = vsel %vm563_vm3, %v589_v16, %v590_v46  ;;  %v904_v27 = vmul.f32 %v2059_v42, %v2301_v15  ;;  %v715_v20 = vsel %vm563_vm3, %v713_v19, %v714_v34  ;;  %v1028_v29 = vmul.f32 %v2062_v43, %v2350_v32 }
  0x89   : > { %v1126_v56 = vadd.f32 %v1085_v18, %v1002_v23  ;;  %v630_v33 = vadd.f32 %v591_v62, %v505_v28  ;;  %v839_v55 = vsel %vm563_vm3, %v837_v36, %v838_v38  ;;  %v962_v47 = vrot.slane %v903_v40, 2 }
  0x8a   : > { %v963_v39 = vrot.slane %v904_v27, 2  ;;  %v1029_v37 = vmul.f32 %v2062_v43, %v2365_v48  ;;  %v1086_v60 = vrot.slane %v1028_v29, 2  ;;  %v1152_v50 = vmul.f32 %v2064_v44, %v2417_v41 }
  0x8b   : > { %v1250_v49 = vadd.f32 %v1209_v2, %v1126_v56  ;;  %v754_v4 = vadd.f32 %v715_v20, %v630_v33  ;;  %v1153_v53 = vmul.f32 %v2064_v44, %v2437_v11  ;;  %v418_v0 = vmul.f32 %v2019_v24, %v2301_v15 }
  0x8c   : > { %v964_v51 = vsel %vm936_vm4, %v962_v47, %v963_v39  ;;  %v1087_v52 = vrot.slane %v1029_v37, 2  ;;  %v1210_v22 = vrot.slane %v1152_v50, 2  ;;  %v454_v3 = vmul.f32 %v2022_v25, %v2365_v48 }
  0x8d   : > { %1682 = vmatmul.mubr.msk.f32.vlgmr.msra.gmra.mrb[0].mxu1 %vm331_vm1, %v1250_v49  ;;  %v878_v14 = vadd.f32 %v839_v55, %v754_v4  ;;  %v490_v7 = vmul.f32 %v2032_v30, %v2437_v11  ;;  %v1211_v61 = vrot.slane %v1153_v53, 2  ;;  %v532_v45 = vmul.f32 %v2024_v26, %v2325_v59  ;;  %v2509_v4 = vld [vmem:[#allocation2 + $0xc8] sm:$0xff] }
  0x8e   : > { %v1088_v8 = vsel %vm936_vm4, %v1086_v60, %v1087_v52  ;;  %v657_v58 = vmul.f32 %v2035_v31, %v2392_v17  ;;  %v470_v18 = vadd.f32 %v454_v3, %v418_v0  ;;  %v781_v1 = vmul.f32 %v2043_v35, %v2461_v54 }
  0x8f   : > { %v1003_v15 = vadd.f32 %v964_v51, %v878_v14  ;;  %v905_v57 = vmul.f32 %v2059_v42, %v2325_v59  ;;  %v1212_v2 = vsel %vm936_vm4, %v1210_v22, %v1211_v61  ;;  %v592_v6 = vrot.slane %v532_v45, 1  ;;  %v2486_v59 = vld [vmem:[#allocation2 + $0xc0] sm:$0xff] }
  0x90   : > { %v716_v63 = vrot.slane %v657_v58, 1  ;;  %v1030_v9 = vmul.f32 %v2062_v43, %v2392_v17  ;;  %v506_v13 = vadd.f32 %v490_v7, %v470_v18  ;;  %v840_v12 = vrot.slane %v781_v1, 1 }
  0x91   : > { %v1127_v10 = vadd.f32 %v1088_v8, %v1003_v15  ;;  %v965_v5 = vrot.slane %v905_v57, 2  ;;  %v593_v16 = vsel %vm563_vm3, %v590_v46, %v592_v6  ;;  %v1154_v23 = vmul.f32 %v2064_v44, %v2461_v54 }
  0x92   : > { %v717_v19 = vsel %vm563_vm3, %v714_v34, %v716_v63  ;;  %v1089_v21 = vrot.slane %v1030_v9, 2  ;;  %v631_v36 = vadd.f32 %v593_v16, %v506_v13  ;;  %v841_v62 = vsel %vm563_vm3, %v838_v38, %v840_v12  ;;  %v2531_v16 = vld [vmem:[#allocation2 + $0xd0] sm:$0x3] }
  0x93   : > { %v1251_v28 = vadd.f32 %v1212_v2, %v1127_v10  ;;  %v966_v40 = vsel %vm936_vm4, %v963_v39, %v965_v5  ;;  %v1213_v56 = vrot.slane %v1154_v23, 2  ;;  %v419_v46 = vmul.f32 %v2019_v24, %v2350_v32 }
  0x94   : > { %v1090_v27 = vsel %vm936_vm4, %v1087_v52, %v1089_v21  ;;  %v455_v34 = vmul.f32 %v2022_v25, %v2417_v41  ;;  %v755_v33 = vadd.f32 %v717_v19, %v631_v36  ;;  %v491_v20 = vmul.f32 %v2032_v30, %v2486_v59 }
  0x95   : > { %1684 = vmatprep.mubr.msk.f32.mxu1 %vm331_vm1, %v1251_v28  ;;  %v533_v38 = vmul.f32 %v2024_v26, %v2350_v32  ;;  %v2502_v29 = vmul.f32 %v2024_v26, %v2365_v48  ;;  %v1214_v55 = vsel %vm936_vm4, %v1211_v61, %v1213_v56  ;;  %v658_v39 = vmul.f32 %v2035_v31, %v2417_v41 }
  0x96   : > { %v471_v47 = vadd.f32 %v455_v34, %v419_v46  ;;  %v659_v37 = vmul.f32 %v2035_v31, %v2437_v11  ;;  %v879_v49 = vadd.f32 %v841_v62, %v755_v33  ;;  %v782_v51 = vmul.f32 %v2043_v35, %v2486_v59 }
  0x97   : > { %v594_v60 = vrot.slane %v533_v38, 1  ;;  %v595_v50 = vrot.slane %v2502_v29, 1  ;;  %v718_v53 = vrot.slane %v658_v39, 1  ;;  %v783_v14 = vmul.f32 %v2043_v35, %v2509_v4 }
  0x98   : > { %v507_v52 = vadd.f32 %v491_v20, %v471_v47  ;;  %v719_v0 = vrot.slane %v659_v37, 1  ;;  %v1004_v22 = vadd.f32 %v966_v40, %v879_v49  ;;  %v842_v7 = vrot.slane %v782_v51, 1 }
  0x99   : > { %v596_v3 = vsel %vm563_vm3, %v594_v60, %v595_v50  ;;  %v906_v8 = vmul.f32 %v2059_v42, %v2350_v32  ;;  %v843_v58 = vrot.slane %v783_v14, 1  ;;  %v907_v15 = vmul.f32 %v2059_v42, %v2365_v48  ;;  %v398_v14 = vld [vmem:[#allocation2 + $0xe0] sm:$0xff] }
  0x9a   : > { %v632_v61 = vadd.f32 %v596_v3, %v507_v52  ;;  %v720_v45 = vsel %vm563_vm3, %v718_v53, %v719_v0  ;;  %v1128_v18 = vadd.f32 %v1090_v27, %v1004_v22  ;;  %v1031_v57 = vmul.f32 %v2062_v43, %v2417_v41  ;;  %v397_v53 = vld [vmem:[#allocation2 + $0xd8] sm:$0xff] }
  0x9b   : > { %v967_v1 = vrot.slane %v906_v8, 2  ;;  %v1032_v2 = vmul.f32 %v2062_v43, %v2437_v11  ;;  %v844_v63 = vsel %vm563_vm3, %v842_v7, %v843_v58  ;;  %v968_v9 = vrot.slane %v907_v15, 2 }
  0x9c   : > { %v756_v6 = vadd.f32 %v720_v45, %v632_v61  ;;  %v1155_v32 = vmul.f32 %v2064_v44, %v2486_v59  ;;  %v1252_v10 = vadd.f32 %v1214_v55, %v1128_v18  ;;  %v1091_v13 = vrot.slane %v1031_v57, 2 }
  0x9d   : > { %v1092_v12 = vrot.slane %v1032_v2, 2  ;;  %v1156_v5 = vmul.f32 %v2064_v44, %v2509_v4  ;;  %v969_v21 = vsel %vm936_vm4, %v967_v1, %v968_v9  ;;  %v420_v28 = vmul.f32 %v2019_v24, %v2365_v48 }
  0x9e   : > { %v880_v19 = vadd.f32 %v844_v63, %v756_v6  ;;  %v1215_v23 = vrot.slane %v1155_v32, 2  ;;  %1685 = vmatmul.mubr.msk.f32.gmra.mrb[2].mxu1 %vm331_vm1, %v1252_v10  ;;  %v456_v40 = vmul.f32 %v2022_v25, %v2437_v11  ;;  %v492_v27 = vmul.f32 %v2032_v30, %v2509_v4 }
  0x9f   : > { %v1093_v36 = vsel %vm936_vm4, %v1091_v13, %v1092_v12  ;;  %v1216_v62 = vrot.slane %v1156_v5, 2  ;;  %v535_v46 = vmul.f32 %v2024_v26, %v2392_v17  ;;  %v660_v34 = vmul.f32 %v2035_v31, %v2461_v54 }
  0xa0   : > { %v1005_v56 = vadd.f32 %v969_v21, %v880_v19  ;;  %v784_v48 = vmul.f32 %v2043_v35, %v2531_v16  ;;  %v472_v20 = vadd.f32 %v456_v40, %v420_v28  ;;  %v908_v38 = vmul.f32 %v2059_v42, %v2392_v17 }
  0xa1   : > { %v1217_v33 = vsel %vm936_vm4, %v1215_v23, %v1216_v62  ;;  %v1033_v29 = vmul.f32 %v2062_v43, %v2461_v54  ;;  %v597_v47 = vrot.slane %v535_v46, 1  ;;  %v721_v39 = vrot.slane %v660_v34, 1 }
  0xa2   : > { %v1129_v55 = vadd.f32 %v1093_v36, %v1005_v56  ;;  %v845_v37 = vrot.slane %v784_v48, 1  ;;  %v508_v49 = vadd.f32 %v492_v27, %v472_v20  ;;  %v970_v60 = vrot.slane %v908_v38, 2 }
  0xa3   : > { %v1094_v51 = vrot.slane %v1033_v29, 2  ;;  %v1157_v52 = vmul.f32 %v2064_v44, %v2531_v16  ;;  %v598_v3 = vsel %vm563_vm3, %v595_v50, %v597_v47  ;;  %v722_v17 = vsel %vm563_vm3, %v719_v0, %v721_v39 }
  0xa4   : > { %v1253_v22 = vadd.f32 %v1217_v33, %v1129_v55  ;;  %v846_v7 = vsel %vm563_vm3, %v843_v58, %v845_v37  ;;  %v633_v8 = vadd.f32 %v598_v3, %v508_v49  ;;  %v971_v61 = vsel %vm936_vm4, %v968_v9, %v970_v60 }
  0xa5   : > { %v1095_v45 = vsel %vm936_vm4, %v1092_v12, %v1094_v51  ;;  %v1218_v15 = vrot.slane %v1157_v52, 2  ;;  %v421_v18 = vmul.f32 %v2019_v24, %v2417_v41  ;;  %v457_v1 = vmul.f32 %v2022_v25, %v2486_v59  ;;  %v399_v51 = vld [vmem:[#allocation2 + $0xe8] sm:$0x3] }
  0xa6   : > { %1687 = vmatprep.mubr.msk.f32.mxu1 %vm331_vm1, %v1253_v22  ;;  %v493_v50 = vmul.f32 %v2032_v30, %v397_v53  ;;  %v494_v0 = vmul.f32 %v2032_v30, %v398_v14  ;;  %v757_v57 = vadd.f32 %v722_v17, %v633_v8  ;;  %v536_v2 = vmul.f32 %v2024_v26, %v2417_v41 }
  0xa7   : > { %v1219_v58 = vsel %vm936_vm4, %v1216_v62, %v1218_v15  ;;  %v537_v6 = vmul.f32 %v2024_v26, %v2437_v11  ;;  %v473_v63 = vadd.f32 %v457_v1, %v421_v18  ;;  %v661_v9 = vmul.f32 %v2035_v31, %v2486_v59 }
  0xa8   : > { %v662_v32 = vmul.f32 %v2035_v31, %v2509_v4  ;;  %v785_v10 = vmul.f32 %v2043_v35, %v397_v53  ;;  %v881_v13 = vadd.f32 %v846_v7, %v757_v57  ;;  %v599_v30 = vrot.slane %v536_v2, 1 }
  0xa9   : > { %v600_v12 = vrot.slane %v537_v6, 1  ;;  %v786_v5 = vmul.f32 %v2043_v35, %v398_v14  ;;  %v509_v19 = vadd.f32 %v493_v50, %v473_v63  ;;  %v723_v21 = vrot.slane %v661_v9, 1 }
  0xaa   : > { %v724_v23 = vrot.slane %v662_v32, 1  ;;  %v847_v28 = vrot.slane %v785_v10, 1  ;;  %v1006_v36 = vadd.f32 %v971_v61, %v881_v13  ;;  %v909_v27 = vmul.f32 %v2059_v42, %v2417_v41 }
  0xab   : > { %v601_v62 = vsel %vm563_vm3, %v599_v30, %v600_v12  ;;  %v848_v40 = vrot.slane %v786_v5, 1  ;;  %v910_v34 = vmul.f32 %v2059_v42, %v2437_v11  ;;  %v1034_v48 = vmul.f32 %v2062_v43, %v2486_v59 }
  0xac   : > { %v634_v56 = vadd.f32 %v601_v62, %v509_v19  ;;  %v725_v46 = vsel %vm563_vm3, %v723_v21, %v724_v23  ;;  %v1130_v33 = vadd.f32 %v1095_v45, %v1006_v36  ;;  %v972_v38 = vrot.slane %v909_v27, 2 }
  0xad   : > { %v849_v20 = vsel %vm563_vm3, %v847_v28, %v848_v40  ;;  %v1035_v29 = vmul.f32 %v2062_v43, %v2509_v4  ;;  %v973_v47 = vrot.slane %v910_v34, 2  ;;  %v1096_v39 = vrot.slane %v1034_v48, 2 }
  0xae   : > { %v758_v55 = vadd.f32 %v725_v46, %v634_v56  ;;  %v1158_v41 = vmul.f32 %v2064_v44, %v397_v53  ;;  %v1254_v37 = vadd.f32 %v1219_v58, %v1130_v33  ;;  %v1159_v60 = vmul.f32 %v2064_v44, %v398_v14 }
  0xaf   : > { %v1097_v49 = vrot.slane %v1035_v29, 2  ;;  %v422_v59 = vmul.f32 %v2019_v24, %v2437_v11  ;;  %v974_v22 = vsel %vm936_vm4, %v972_v38, %v973_v47  ;;  %v458_v17 = vmul.f32 %v2022_v25, %v2509_v4 }
  0xb0   : > { %v882_v52 = vadd.f32 %v849_v20, %v758_v55  ;;  %v1220_v3 = vrot.slane %v1158_v41, 2  ;;  %1688 = vmatmul.mubr.msk.f32.gmra.mrb[4].mxu1 %vm331_vm1, %v1254_v37  ;;  %v1221_v53 = vrot.slane %v1159_v60, 2  ;;  %v538_v8 = vmul.f32 %v2024_v26, %v2461_v54 }
  0xb1   : > { %v1098_v7 = vsel %vm936_vm4, %v1096_v39, %v1097_v49  ;;  %v663_v14 = vmul.f32 %v2035_v31, %v2531_v16  ;;  %v474_v24 = vadd.f32 %v458_v17, %v422_v59  ;;  %v787_v11 = vmul.f32 %v2043_v35, %v399_v51 }
  0xb2   : > { %v1007_v61 = vadd.f32 %v974_v22, %v882_v52  ;;  %v911_v45 = vmul.f32 %v2059_v42, %v2461_v54  ;;  %v1222_v25 = vsel %vm936_vm4, %v1220_v3, %v1221_v53  ;;  %v602_v4 = vrot.slane %v538_v8, 1 }
  0xb3   : > { %v726_v15 = vrot.slane %v663_v14, 1  ;;  %v1036_v18 = vmul.f32 %v2062_v43, %v2531_v16  ;;  %v510_v50 = vadd.f32 %v494_v0, %v474_v24  ;;  %v850_v26 = vrot.slane %v787_v11, 1 }
  0xb4   : > { %v1131_v1 = vadd.f32 %v1098_v7, %v1007_v61  ;;  %v603_v57 = vsel %vm563_vm3, %v600_v12, %v602_v4  ;;  %v975_v58 = vrot.slane %v911_v45, 2  ;;  %v1160_v35 = vmul.f32 %v2064_v44, %v399_v51 }
  0xb5   : > { %v727_v31 = vsel %vm563_vm3, %v724_v23, %v726_v15  ;;  %v635_v6 = vadd.f32 %v603_v57, %v510_v50  ;;  %v851_v42 = vsel %vm563_vm3, %v848_v40, %v850_v26  ;;  %v1099_v54 = vrot.slane %v1036_v18, 2 }
  0xb6   : > { %v1255_v2 = vadd.f32 %v1222_v25, %v1131_v1  ;;  %v976_v43 = vsel %vm936_vm4, %v973_v47, %v975_v58  ;;  %v1223_v16 = vrot.slane %v1160_v35, 2 }
  0xb7   : > { %v759_v63 = vadd.f32 %v727_v31, %v635_v6  ;;  %v1100_v9 = vsel %vm936_vm4, %v1097_v49, %v1099_v54 }
  0xb8   : > { %1690 = vmatprep.mubr.msk.f32.mxu1 %vm331_vm1, %v1255_v2  ;;  %v1224_v10 = vsel %vm936_vm4, %v1221_v53, %v1223_v16 }
  0xb9   : > { %v883_v0 = vadd.f32 %v851_v42, %v759_v63 }
  0xbb   : > { %v1008_v32 = vadd.f32 %v976_v43, %v883_v0 }
  0xbd   : > { %v1132_v13 = vadd.f32 %v1100_v9, %v1008_v32 }
  0xbf   : > { %v1256_v30 = vadd.f32 %v1224_v10, %v1132_v13 }
  0xc1   : > { %1691 = vmatmul.mubr.msk.f32.gmra.mrb[6].mxu1 %vm331_vm1, %v1256_v30 }
 0x11a   : > { %v1671_v44 = vpop.f32.mrb[0].mxu0 }
 0x11b   : > { %v1376_v12 = vpop.f32.mrb[1].mxu0 }
 0x11c   : > { %1455 = vxpose.xlu0.b32.start [1/16] (narrow) %v1376_v12, 8 }
 0x120   : > { %1456 = vxpose.xlu0.b32.cont [2/16] (narrow) %v1671_v44, 8 }
 0x12b   : > { %v1674_v5 = vpop.f32.mrb[2].mxu0 }
 0x12c   : > { %v1386_v19 = vpop.f32.mrb[3].mxu0 }
 0x12d   : > { %1457 = vxpose.xlu0.b32.cont [3/16] (narrow) %v1386_v19, 8 }
 0x131   : > { %1458 = vxpose.xlu0.b32.cont [4/16] (narrow) %v1674_v5, 8 }
 0x13d   : > { %v1677_v21 = vpop.f32.mrb[4].mxu0 }
 0x13e   : > { %v1396_v23 = vpop.f32.mrb[5].mxu0 }
 0x13f   : > { %1459 = vxpose.xlu0.b32.cont [5/16] (narrow) %v1396_v23, 8 }
 0x143   : > { %1460 = vxpose.xlu0.b32.cont [6/16] (narrow) %v1677_v21, 8 }
 0x14f   : > { %v1680_v28 = vpop.f32.mrb[6].mxu0 }
 0x150   : > { %v1406_v36 = vpop.f32.mrb[7].mxu0 }
 0x151   : > { %1461 = vxpose.xlu0.b32.cont [7/16] (narrow) %v1406_v36, 8 }
 0x155   : > { %1462 = vxpose.xlu0.b32.cont [8/16] (narrow) %v1680_v28, 8 }
 0x160   : > { %v1683_v62 = vpop.f32.mrb[0].mxu1 }
 0x161   : > { %v1416_v40 = vpop.f32.mrb[1].mxu1 }
 0x162   : > { %1463 = vxpose.xlu0.b32.cont [9/16] (narrow) %v1416_v40, 8 }
 0x166   : > { %1464 = vxpose.xlu0.b32.cont [10/16] (narrow) %v1683_v62, 8 }
 0x171   : > { %v1686_v27 = vpop.f32.mrb[2].mxu1 }
 0x172   : > { %v1426_v56 = vpop.f32.mrb[3].mxu1 }
 0x173   : > { %1465 = vxpose.xlu0.b32.cont [11/16] (narrow) %v1426_v56, 8 }
 0x177   : > { %1466 = vxpose.xlu0.b32.cont [12/16] (narrow) %v1686_v27, 8 }
 0x183   : > { %v1689_v46 = vpop.f32.mrb[4].mxu1 }
 0x184   : > { %v1436_v34 = vpop.f32.mrb[5].mxu1 }
 0x185   : > { %1467 = vxpose.xlu0.b32.cont [13/16] (narrow) %v1436_v34, 8 }
 0x189   : > { %1468 = vxpose.xlu0.b32.cont [14/16] (narrow) %v1689_v46, 8 }
 0x194   : > { %v1692_v48 = vpop.f32.mrb[6].mxu1 }
 0x195   : > { %v1446_v33 = vpop.f32.mrb[7].mxu1 }
 0x196   : > { %1469 = vxpose.xlu0.b32.cont [15/16] (narrow) %v1446_v33, 8 }
 0x19a   : > { %1470 = vxpose.xlu0.b32.end [16/16] (narrow) %v1692_v48, 8 }
 0x1de   : > { %v1471_v20 = vpop.trf.xlu0 }
 0x1df   : > { %1487 = vst [vmem:[%s270_s12] sm:$0xff] %v1471_v20 }
 0x1e0   : > { %1782 = shalt.err (!%p1779_p9)
}
 0x1e1   : > { %s1783_s6 = scalar_lea.hbm %s2625_s11, 128  ;;  %s1787_s10 = scalar_lea.hbm %s2680_s4, 512 }
 0x1e2   : > { %p1784_p10 = scmp.ne.s32.totalorder %s2625_s11, %s1783_s6  ;;  %p1788_p13 = scmp.lt.u32.totalorder %s2625_s11, %s2680_s4 }
 0x1e3   : > { %p1789_p0 = scmp.lt.u32.totalorder %s1787_s10, %s1783_s6  ;;  %p1791_p2 = scmp.lt.u32.totalorder %s1783_s6, %s2625_s11 }
 0x1e4   : > { %p1785_p11 = pnand %p1784_p10, %p1942_p3 }
 0x1e5   : > { %p1790_p1 = por %p1789_p0, %p1788_p13 }
 0x1e6   : > { %p1786_p12 = pneg %p1785_p11 }
 0x1e7   : > { %p1792_p4 = por %p1791_p2, %p1790_p1 }
 0x1e9   : > { %p1793_p5 = pnand %p1792_p4, %p1786_p12 }
 0x1eb   : > { %1796 = shalt.err (!%p1793_p5)
}
 0x1ec   : > { %1698 = dma.vmem_to_hbm [thread:$0]  (%p1942_p3), %s2620_s23, 128, %s2625_s11, %s1489_s13  }
 0x1ed PF: > { %p1704_p6 = scmp.ge.s32.totalorder %s1863_s22, 2  ;;  %s1516_s27 = sand.u32 1, %s1835_s15  }
 0x1ee   : > { %s1517_s30 = scalar_lea.sflag [#allocation4], %s1516_s27 }
 0x1ef   : > { %p1701_p7 = pnand %p1704_p6, %p1951_p8 }
 0x1f1   : > { %1830 = dma.done.wait (!%p1701_p7), %s1517_s30, 128  }
 0x1f2   : > { %1832 = vsyncadd (!%p1701_p7), %s1517_s30, 4294967168  ;;  %s17_s22 = sadd.s32 1, %s1863_s22   ;;  %s2683_s15 = smov %s1839_s16 }
 0x1f3   : > { %p14_p9 = scmp.ge.s32.totalorder %s17_s22, 6   ;;  %s2684_s16 = smov %s1843_s17 }
 0x1f4   : > { %s2685_s17 = smov %s1960_s7  ;;  %s2686_s18 = smov %s1855_s20 }
 0x1f5   : > { %s2687_s19 = smov %s1859_s21  ;;  %s2688_s20 = smov %s2691_s25 }
 0x1f6   : > { %s2689_s21 = smov %s2695_s26  ;;  %16 = sbr.rel (!%p14_p9) target bundleno = 5 (0x5), region = 75 }
 0x1fd   :  { %1522 = vsyncpa [#allocation4], 1 }
 0x1fe   :  { %1524 = vsyncpa [#allocation4 + $0x1], 1 }

</bundles_post_ra>
